<compile_context>
chip_gen: v7x
topology: tpu7x:2x2x1
jax: 0.10.0
libtpu: 0.0.40
codegen_flags: <defaults>
</compile_context>

<pallas_src>
import jax
import jax.numpy as jnp
from jax import lax
from jax.experimental import pallas as pl
from jax.experimental.pallas import tpu as pltpu


def _round_up(x, m):
    return (x + m - 1) // m * m


# ---------------------------------------------------------------------------
# Pallas kernels
# ---------------------------------------------------------------------------
def _conv_relu_pool_kernel(p_ref, w_ref, b_ref, o_ref):
    """Fused conv(as one block-diag matmul) + bias + ReLU + 2x2 max-pool.

    p_ref : (4*K_pad, tM) bf16  im2col patches; the 4 row-groups are the 4
                                positions of each 2x2 pool window; columns
                                are ordered (b, ph, pw).
    w_ref : (4*OC, 4*K_pad) bf16  block-diagonal conv weights (one (OC, K_pad)
                                copy per pool-window position).
    b_ref : (OC, 1) f32.
    o_ref : (OC, tM) bf16.
    """
    oc = o_ref.shape[0]
    acc = jnp.dot(w_ref[...], p_ref[...], preferred_element_type=jnp.float32)
    m = jnp.maximum(jnp.maximum(acc[0 * oc:1 * oc], acc[1 * oc:2 * oc]),
                    jnp.maximum(acc[2 * oc:3 * oc], acc[3 * oc:4 * oc]))
    # Bias is constant over the pool window and ReLU is monotone, so applying
    # them after the window max is exact (f32 epilogue; bf16 store).
    o_ref[...] = jnp.maximum(m + b_ref[...], 0.0).astype(o_ref.dtype)


def _fc_stack_kernel(x_ref, w1_ref, b1_ref, w2_ref, b2_ref, w3_ref, b3_ref,
                     o_ref):
    """fc1(+relu) -> fc2(+relu) -> fc3 fused; intermediates never leave VMEM."""
    h = jnp.dot(x_ref[...], w1_ref[...], preferred_element_type=jnp.float32)
    h = jnp.maximum(h + b1_ref[...], 0.0).astype(x_ref.dtype)
    h = jnp.dot(h, w2_ref[...], preferred_element_type=jnp.float32)
    h = jnp.maximum(h + b2_ref[...], 0.0).astype(x_ref.dtype)
    o_ref[...] = (jnp.dot(h, w3_ref[...], preferred_element_type=jnp.float32)
                  + b3_ref[...])


# ---------------------------------------------------------------------------
# Wrappers
# ---------------------------------------------------------------------------
def conv_relu_pool(x, w_bd, b, *, k, lhs_spec):
    """maxpool2x2(relu(conv_valid(x, w))) -> (OC, B, POH, POW) bfloat16.

    x: bf16 feature map laid out per `lhs_spec` ('NCHW' or 'CNHW').
    w_bd: (4*OC, 4*K_pad) bf16 block-diagonal packed weights.
    b: (OC, 1) f32.
    Assumes stride-1 VALID conv with even output spatial dims (LeNet 32x32).
    """
    OC = w_bd.shape[0] // 4
    K_pad = w_bd.shape[1] // 4

    # TODO(synk): the strided patch gather stays in XLA glue; an in-kernel DMA
    # gather from a VMEM-resident input would avoid materializing the patch
    # matrix in HBM entirely.
    cols = []
    for wh in (0, 1):
        for ww in (0, 1):
            p = lax.conv_general_dilated_patches(
                x[..., wh:, ww:], (k, k), (2, 2), "VALID",
                dimension_numbers=(lhs_spec, "OIHW", "CNHW"))
            cols.append(p)  # (K, B, POH, POW), patch order (c, kh, kw)
    K, B, POH, POW = cols[0].shape
    assert K <= K_pad
    Mp = B * POH * POW
    Mp_pad = _round_up(Mp, 128)

    # Single preallocated padded buffer; each pool-window position is written
    # exactly once (no stack-then-pad double materialization).
    patches = jnp.zeros((4 * K_pad, Mp_pad), jnp.bfloat16)
    for i, c in enumerate(cols):
        patches = lax.dynamic_update_slice(
            patches, c.reshape(K, Mp).astype(jnp.bfloat16), (i * K_pad, 0))

    # Tile the pooled-column dim; prefer big tiles but keep >=2 grid steps
    # when possible so both v7x TensorCores get work.
    cap = Mp_pad if Mp_pad < 256 else min(Mp_pad // 2, 2048)
    tM = 128
    for cand in range(128, cap + 1, 128):
        if Mp_pad % cand == 0:
            tM = cand
    grid = (Mp_pad // tM,)

    flops = 2 * (4 * OC) * (4 * K_pad) * Mp_pad
    bytes_accessed = (int(patches.size) * 2 + int(w_bd.size) * 2
                      + int(b.size) * 4 + OC * Mp_pad * 2)

    out = pl.pallas_call(
        _conv_relu_pool_kernel,
        out_shape=jax.ShapeDtypeStruct((OC, Mp_pad), jnp.bfloat16),
        grid=grid,
        in_specs=[
            pl.BlockSpec((4 * K_pad, tM), lambda j: (0, j)),
            pl.BlockSpec((4 * OC, 4 * K_pad), lambda j: (0, 0)),
            pl.BlockSpec((OC, 1), lambda j: (0, 0)),
        ],
        out_specs=pl.BlockSpec((OC, tM), lambda j: (0, j)),
        compiler_params=pltpu.CompilerParams(
            dimension_semantics=("parallel",)),
        cost_estimate=pl.CostEstimate(
            flops=int(flops), transcendentals=0,
            bytes_accessed=int(bytes_accessed)),
    )(patches, w_bd, b)

    return out[:, :Mp].reshape(OC, B, POH, POW)


def fc_stack(x, w1, b1, w2, b2, w3, b3):
    """x: (B, 400) bf16 -> (B, 128) f32 logits slab (cols >= 10 are zero)."""
    B, K1 = x.shape
    N = w3.shape[1]

    # Grid over batch rows only when it is big and cleanly divisible; at tiny
    # batch a single full block is optimal (and (B, K1) = full dims is legal).
    tB = B
    if B % 256 == 0 and B // 256 >= 2:
        tB = 256
    grid = (B // tB,)

    flops = 2 * B * (w1.shape[0] * w1.shape[1] + w2.shape[0] * w2.shape[1]
                     + w3.shape[0] * w3.shape[1])
    bytes_accessed = sum(int(a.size) * a.dtype.itemsize
                         for a in (x, w1, b1, w2, b2, w3, b3)) + B * N * 4

    return pl.pallas_call(
        _fc_stack_kernel,
        out_shape=jax.ShapeDtypeStruct((B, N), jnp.float32),
        grid=grid,
        in_specs=[
            pl.BlockSpec((tB, K1), lambda i: (i, 0)),
            pl.BlockSpec(w1.shape, lambda i: (0, 0)),
            pl.BlockSpec(b1.shape, lambda i: (0, 0)),
            pl.BlockSpec(w2.shape, lambda i: (0, 0)),
            pl.BlockSpec(b2.shape, lambda i: (0, 0)),
            pl.BlockSpec(w3.shape, lambda i: (0, 0)),
            pl.BlockSpec(b3.shape, lambda i: (0, 0)),
        ],
        out_specs=pl.BlockSpec((tB, N), lambda i: (i, 0)),
        compiler_params=pltpu.CompilerParams(
            dimension_semantics=("parallel",)),
        cost_estimate=pl.CostEstimate(
            flops=int(flops), transcendentals=0,
            bytes_accessed=int(bytes_accessed)),
    )(x, w1, b1, w2, b2, w3, b3)


# ---------------------------------------------------------------------------
# Parameters: PyTorch-style uniform(-1/sqrt(fan_in), 1/sqrt(fan_in)), then
# pre-packed once (block-diag / transpose / minimal zero-pad, bf16 MXU dtypes).
# ---------------------------------------------------------------------------
def init_params(key):
    ks = jax.random.split(key, 10)

    def u(k, shape, fan_in):
        bound = 1.0 / float(fan_in) ** 0.5
        return jax.random.uniform(k, shape, jnp.float32, -bound, bound)

    conv1_w = u(ks[0], (6, 3, 5, 5), 75)
    conv1_b = u(ks[1], (6,), 75)
    conv2_w = u(ks[2], (16, 6, 5, 5), 150)
    conv2_b = u(ks[3], (16,), 150)
    fc1_w = u(ks[4], (120, 400), 400)
    fc1_b = u(ks[5], (120,), 400)
    fc2_w = u(ks[6], (84, 120), 120)
    fc2_b = u(ks[7], (84,), 120)
    fc3_w = u(ks[8], (10, 84), 84)
    fc3_b = u(ks[9], (10,), 84)

    def pad2(a, r, c):
        return jnp.zeros((r, c), a.dtype).at[:a.shape[0], :a.shape[1]].set(a)

    def conv_blockdiag(w2d, oc_pad, k_pad):
        blk = pad2(w2d, oc_pad, k_pad)
        out = jnp.zeros((4 * oc_pad, 4 * k_pad), w2d.dtype)
        for i in range(4):
            out = out.at[i * oc_pad:(i + 1) * oc_pad,
                         i * k_pad:(i + 1) * k_pad].set(blk)
        return out.astype(jnp.bfloat16)

    # conv1: OC padded 6->8 (sublane-dense output), K = 3*25 = 75 -> 80.
    c1 = conv1_w.reshape(6, 75)
    # conv2: input channels padded 6->8 so conv1's two exact-zero pad channels
    # are absorbed by zero weights; K = 8*25 = 200 (already multiple of 8).
    c2 = jnp.zeros((16, 8, 5, 5), jnp.float32).at[:, :6].set(conv2_w)
    c2 = c2.reshape(16, 200)

    return {
        "conv1_w": conv_blockdiag(c1, 8, 80),             # (32, 320) bf16
        "conv1_b": pad2(conv1_b.reshape(6, 1), 8, 1),     # (8, 1) f32
        "conv2_w": conv_blockdiag(c2, 16, 200),           # (64, 800) bf16
        "conv2_b": conv2_b.reshape(16, 1),                # (16, 1) f32
        # fc weights pre-transposed to (K, N); outputs padded to 128 lanes so
        # every store in the FC kernel is lane-dense (incl. fc3).
        "fc1_w": pad2(fc1_w.T, 400, 128).astype(jnp.bfloat16),   # (400, 128)
        "fc1_b": pad2(fc1_b.reshape(1, 120), 1, 128),            # f32 (1, 128)
        "fc2_w": pad2(fc2_w.T, 128, 128).astype(jnp.bfloat16),   # (128, 128)
        "fc2_b": pad2(fc2_b.reshape(1, 84), 1, 128),             # f32 (1, 128)
        "fc3_w": pad2(fc3_w.T, 128, 128).astype(jnp.bfloat16),   # (128, 128)
        "fc3_b": pad2(fc3_b.reshape(1, 10), 1, 128),             # f32 (1, 128)
    }


# ---------------------------------------------------------------------------
# Forward pass (mirrors Net.forward)
# ---------------------------------------------------------------------------
@jax.jit
def net_forward(p, x):
    B = x.shape[0]
    x = x.astype(jnp.bfloat16)                              # (B, 3, 32, 32)

    # conv1 -> relu -> pool: (8, B, 14, 14) bf16; channels 6,7 are exact zeros.
    a1 = conv_relu_pool(x, p["conv1_w"], p["conv1_b"], k=5, lhs_spec="NCHW")
    # conv2 -> relu -> pool: (16, B, 5, 5) bf16 (pad channels absorbed by
    # zero weight columns -- no [:6] slice / extra HBM pass needed).
    a2 = conv_relu_pool(a1, p["conv2_w"], p["conv2_b"], k=5, lhs_spec="CNHW")

    # torch.flatten(x, 1): (B, 16*5*5) with c slowest, w fastest.
    # TODO(synk): this small transpose/reshape stays in XLA glue.
    xf = a2.transpose(1, 0, 2, 3).reshape(B, 16 * 5 * 5)    # (B, 400) bf16

    logits = fc_stack(xf, p["fc1_w"], p["fc1_b"], p["fc2_w"], p["fc2_b"],
                      p["fc3_w"], p["fc3_b"])               # (B, 128) f32
    return logits[:, :10]


if __name__ == "__main__":
    key = jax.random.PRNGKey(0)
    pkey, xkey = jax.random.split(key)
    params = init_params(pkey)
    # LeNet forward requires 3x32x32 input (flatten sees 16*5*5 after two
    # conv+pool stages).
    x = jax.random.normal(xkey, (2, 3, 32, 32), dtype=jnp.float32)

    out = net_forward(params, x)
    out = jax.block_until_ready(out)

    assert out.shape == (2, 10), out.shape
    assert bool(jnp.all(jnp.isfinite(out)))
    print("KERNEL_OK")
</pallas_src>

<mosaic_0001>
module attributes {stable_mosaic.version = 11 : i64} {
  func.func @_conv_relu_pool_kernel(%arg0: i32, %arg1: memref<320x256xbf16, #tpu.memory_space<vmem>>, %arg2: memref<32x320xbf16, #tpu.memory_space<vmem>>, %arg3: memref<8x1xf32, #tpu.memory_space<vmem>>, %arg4: memref<8x256xbf16, #tpu.memory_space<vmem>>) attributes {dimension_semantics = [#tpu.dimension_semantics<parallel>], iteration_bounds = array<i64: 2>, scalar_prefetch = 0 : i64, scratch_operands = 0 : i64, tpu.core_type = #tpu.core_type<tc>, window_params = [{transform_indices = @transform_0, window_bounds = array<i64: 320, 256>}, {pipeline_mode = #tpu.pipeline_mode<synchronous>, transform_indices = @transform_1, window_bounds = array<i64: 32, 320>}, {pipeline_mode = #tpu.pipeline_mode<synchronous>, transform_indices = @transform_2, window_bounds = array<i64: 8, 1>}, {transform_indices = @transform_3, window_bounds = array<i64: 8, 256>}]} {
    %c0 = arith.constant 0 : index
    %c0_0 = arith.constant 0 : index
    %0 = vector.load %arg2[%c0, %c0_0] : memref<32x320xbf16, #tpu.memory_space<vmem>>, vector<32x320xbf16>
    %c0_1 = arith.constant 0 : index
    %c0_2 = arith.constant 0 : index
    %1 = vector.load %arg1[%c0_1, %c0_2] : memref<320x256xbf16, #tpu.memory_space<vmem>>, vector<320x256xbf16>
    %cst = arith.constant dense<0.000000e+00> : vector<32x256xf32>
    %2 = tpu.matmul %0, %1, %cst {dimension_numbers = #tpu.dot_dimension_numbers<[1], [0], [0], [1], [0, 0, 1, 1], [], []>} : vector<32x320xbf16>, vector<320x256xbf16>, vector<32x256xf32> -> vector<32x256xf32>
    %3 = vector.extract_strided_slice %2 {offsets = [0, 0], sizes = [8, 256], strides = [1, 1]} : vector<32x256xf32> to vector<8x256xf32>
    %4 = vector.extract_strided_slice %2 {offsets = [8, 0], sizes = [8, 256], strides = [1, 1]} : vector<32x256xf32> to vector<8x256xf32>
    %5 = arith.maximumf %3, %4 : vector<8x256xf32>
    %6 = vector.extract_strided_slice %2 {offsets = [16, 0], sizes = [8, 256], strides = [1, 1]} : vector<32x256xf32> to vector<8x256xf32>
    %7 = vector.extract_strided_slice %2 {offsets = [24, 0], sizes = [8, 256], strides = [1, 1]} : vector<32x256xf32> to vector<8x256xf32>
    %8 = arith.maximumf %6, %7 : vector<8x256xf32>
    %9 = arith.maximumf %5, %8 : vector<8x256xf32>
    %c0_3 = arith.constant 0 : index
    %c0_4 = arith.constant 0 : index
    %10 = vector.load %arg3[%c0_3, %c0_4] : memref<8x1xf32, #tpu.memory_space<vmem>>, vector<8x1xf32>
    %11 = vector.broadcast %10 : vector<8x1xf32> to vector<8x256xf32>
    %12 = arith.addf %9, %11 : vector<8x256xf32>
    %cst_5 = arith.constant 0.000000e+00 : f32
    %13 = vector.broadcast %cst_5 : f32 to vector<8x256xf32>
    %14 = arith.maximumf %12, %13 : vector<8x256xf32>
    %15 = arith.truncf %14 : vector<8x256xf32> to vector<8x256xbf16>
    %c0_6 = arith.constant 0 : index
    %c0_7 = arith.constant 0 : index
    %16 = vector.load %arg4[%c0_6, %c0_7] : memref<8x256xbf16, #tpu.memory_space<vmem>>, vector<8x256xbf16>
    tpu.vector_store %arg4[%c0_6, %c0_7], %15 {strides = array<i32>} : memref<8x256xbf16, #tpu.memory_space<vmem>>, vector<8x256xbf16>,
    return
  }
  func.func @transform_0(%arg0: i32) -> (i32, i32) {
    %c0_i32 = arith.constant 0 : i32
    %c0_i32_0 = arith.constant 0 : i32
    return %c0_i32, %arg0 : i32, i32
  }
  func.func @transform_1(%arg0: i32) -> (i32, i32) {
    %c0_i32 = arith.constant 0 : i32
    %c0_i32_0 = arith.constant 0 : i32
    %c0_i32_1 = arith.constant 0 : i32
    return %c0_i32, %c0_i32_0 : i32, i32
  }
  func.func @transform_2(%arg0: i32) -> (i32, i32) {
    %c0_i32 = arith.constant 0 : i32
    %c0_i32_0 = arith.constant 0 : i32
    %c0_i32_1 = arith.constant 0 : i32
    return %c0_i32, %c0_i32_0 : i32, i32
  }
  func.func @transform_3(%arg0: i32) -> (i32, i32) {
    %c0_i32 = arith.constant 0 : i32
    %c0_i32_0 = arith.constant 0 : i32
    return %c0_i32, %arg0 : i32, i32
  }
}

module attributes {stable_mosaic.version = 11 : i64} {
  func.func @_conv_relu_pool_kernel(%arg0: i32, %arg1: memref<800x128xbf16, #tpu.memory_space<vmem>>, %arg2: memref<64x800xbf16, #tpu.memory_space<vmem>>, %arg3: memref<16x1xf32, #tpu.memory_space<vmem>>, %arg4: memref<16x128xbf16, #tpu.memory_space<vmem>>) attributes {dimension_semantics = [#tpu.dimension_semantics<parallel>], iteration_bounds = array<i64: 1>, scalar_prefetch = 0 : i64, scratch_operands = 0 : i64, tpu.core_type = #tpu.core_type<tc>, window_params = [{transform_indices = @transform_0, window_bounds = array<i64: 800, 128>}, {pipeline_mode = #tpu.pipeline_mode<synchronous>, transform_indices = @transform_1, window_bounds = array<i64: 64, 800>}, {pipeline_mode = #tpu.pipeline_mode<synchronous>, transform_indices = @transform_2, window_bounds = array<i64: 16, 1>}, {transform_indices = @transform_3, window_bounds = array<i64: 16, 128>}]} {
    %c0 = arith.constant 0 : index
    %c0_0 = arith.constant 0 : index
    %0 = vector.load %arg2[%c0, %c0_0] : memref<64x800xbf16, #tpu.memory_space<vmem>>, vector<64x800xbf16>
    %c0_1 = arith.constant 0 : index
    %c0_2 = arith.constant 0 : index
    %1 = vector.load %arg1[%c0_1, %c0_2] : memref<800x128xbf16, #tpu.memory_space<vmem>>, vector<800x128xbf16>
    %cst = arith.constant dense<0.000000e+00> : vector<64x128xf32>
    %2 = tpu.matmul %0, %1, %cst {dimension_numbers = #tpu.dot_dimension_numbers<[1], [0], [0], [1], [0, 0, 1, 1], [], []>} : vector<64x800xbf16>, vector<800x128xbf16>, vector<64x128xf32> -> vector<64x128xf32>
    %3 = vector.extract_strided_slice %2 {offsets = [0, 0], sizes = [16, 128], strides = [1, 1]} : vector<64x128xf32> to vector<16x128xf32>
    %4 = vector.extract_strided_slice %2 {offsets = [16, 0], sizes = [16, 128], strides = [1, 1]} : vector<64x128xf32> to vector<16x128xf32>
    %5 = arith.maximumf %3, %4 : vector<16x128xf32>
    %6 = vector.extract_strided_slice %2 {offsets = [32, 0], sizes = [16, 128], strides = [1, 1]} : vector<64x128xf32> to vector<16x128xf32>
    %7 = vector.extract_strided_slice %2 {offsets = [48, 0], sizes = [16, 128], strides = [1, 1]} : vector<64x128xf32> to vector<16x128xf32>
    %8 = arith.maximumf %6, %7 : vector<16x128xf32>
    %9 = arith.maximumf %5, %8 : vector<16x128xf32>
    %c0_3 = arith.constant 0 : index
    %c0_4 = arith.constant 0 : index
    %10 = vector.load %arg3[%c0_3, %c0_4] : memref<16x1xf32, #tpu.memory_space<vmem>>, vector<16x1xf32>
    %11 = vector.broadcast %10 : vector<16x1xf32> to vector<16x128xf32>
    %12 = arith.addf %9, %11 : vector<16x128xf32>
    %cst_5 = arith.constant 0.000000e+00 : f32
    %13 = vector.broadcast %cst_5 : f32 to vector<16x128xf32>
    %14 = arith.maximumf %12, %13 : vector<16x128xf32>
    %15 = arith.truncf %14 : vector<16x128xf32> to vector<16x128xbf16>
    %c0_6 = arith.constant 0 : index
    %c0_7 = arith.constant 0 : index
    %16 = vector.load %arg4[%c0_6, %c0_7] : memref<16x128xbf16, #tpu.memory_space<vmem>>, vector<16x128xbf16>
    tpu.vector_store %arg4[%c0_6, %c0_7], %15 {strides = array<i32>} : memref<16x128xbf16, #tpu.memory_space<vmem>>, vector<16x128xbf16>,
    return
  }
  func.func @transform_0(%arg0: i32) -> (i32, i32) {
    %c0_i32 = arith.constant 0 : i32
    %c0_i32_0 = arith.constant 0 : i32
    return %c0_i32, %arg0 : i32, i32
  }
  func.func @transform_1(%arg0: i32) -> (i32, i32) {
    %c0_i32 = arith.constant 0 : i32
    %c0_i32_0 = arith.constant 0 : i32
    %c0_i32_1 = arith.constant 0 : i32
    return %c0_i32, %c0_i32_0 : i32, i32
  }
  func.func @transform_2(%arg0: i32) -> (i32, i32) {
    %c0_i32 = arith.constant 0 : i32
    %c0_i32_0 = arith.constant 0 : i32
    %c0_i32_1 = arith.constant 0 : i32
    return %c0_i32, %c0_i32_0 : i32, i32
  }
  func.func @transform_3(%arg0: i32) -> (i32, i32) {
    %c0_i32 = arith.constant 0 : i32
    %c0_i32_0 = arith.constant 0 : i32
    return %c0_i32, %arg0 : i32, i32
  }
}

module attributes {stable_mosaic.version = 11 : i64} {
  func.func @_fc_stack_kernel(%arg0: i32, %arg1: memref<2x400xbf16, #tpu.memory_space<vmem>>, %arg2: memref<400x128xbf16, #tpu.memory_space<vmem>>, %arg3: memref<1x128xf32, #tpu.memory_space<vmem>>, %arg4: memref<128x128xbf16, #tpu.memory_space<vmem>>, %arg5: memref<1x128xf32, #tpu.memory_space<vmem>>, %arg6: memref<128x128xbf16, #tpu.memory_space<vmem>>, %arg7: memref<1x128xf32, #tpu.memory_space<vmem>>, %arg8: memref<2x128xf32, #tpu.memory_space<vmem>>) attributes {dimension_semantics = [#tpu.dimension_semantics<parallel>], iteration_bounds = array<i64: 1>, scalar_prefetch = 0 : i64, scratch_operands = 0 : i64, tpu.core_type = #tpu.core_type<tc>, window_params = [{transform_indices = @transform_0, window_bounds = array<i64: 2, 400>}, {pipeline_mode = #tpu.pipeline_mode<synchronous>, transform_indices = @transform_1, window_bounds = array<i64: 400, 128>}, {pipeline_mode = #tpu.pipeline_mode<synchronous>, transform_indices = @transform_2, window_bounds = array<i64: 1, 128>}, {pipeline_mode = #tpu.pipeline_mode<synchronous>, transform_indices = @transform_3, window_bounds = array<i64: 128, 128>}, {pipeline_mode = #tpu.pipeline_mode<synchronous>, transform_indices = @transform_4, window_bounds = array<i64: 1, 128>}, {pipeline_mode = #tpu.pipeline_mode<synchronous>, transform_indices = @transform_5, window_bounds = array<i64: 128, 128>}, {pipeline_mode = #tpu.pipeline_mode<synchronous>, transform_indices = @transform_6, window_bounds = array<i64: 1, 128>}, {transform_indices = @transform_7, window_bounds = array<i64: 2, 128>}]} {
    %c0 = arith.constant 0 : index
    %c0_0 = arith.constant 0 : index
    %0 = vector.load %arg1[%c0, %c0_0] : memref<2x400xbf16, #tpu.memory_space<vmem>>, vector<2x400xbf16>
    %c0_1 = arith.constant 0 : index
    %c0_2 = arith.constant 0 : index
    %1 = vector.load %arg2[%c0_1, %c0_2] : memref<400x128xbf16, #tpu.memory_space<vmem>>, vector<400x128xbf16>
    %cst = arith.constant dense<0.000000e+00> : vector<2x128xf32>
    %2 = tpu.matmul %0, %1, %cst {dimension_numbers = #tpu.dot_dimension_numbers<[1], [0], [0], [1], [0, 0, 1, 1], [], []>} : vector<2x400xbf16>, vector<400x128xbf16>, vector<2x128xf32> -> vector<2x128xf32>
    %c0_3 = arith.constant 0 : index
    %c0_4 = arith.constant 0 : index
    %3 = vector.load %arg3[%c0_3, %c0_4] : memref<1x128xf32, #tpu.memory_space<vmem>>, vector<1x128xf32>
    %4 = vector.broadcast %3 : vector<1x128xf32> to vector<2x128xf32>
    %5 = arith.addf %2, %4 : vector<2x128xf32>
    %cst_5 = arith.constant 0.000000e+00 : f32
    %6 = vector.broadcast %cst_5 : f32 to vector<2x128xf32>
    %7 = arith.maximumf %5, %6 : vector<2x128xf32>
    %8 = arith.truncf %7 : vector<2x128xf32> to vector<2x128xbf16>
    %c0_6 = arith.constant 0 : index
    %c0_7 = arith.constant 0 : index
    %9 = vector.load %arg4[%c0_6, %c0_7] : memref<128x128xbf16, #tpu.memory_space<vmem>>, vector<128x128xbf16>
    %cst_8 = arith.constant dense<0.000000e+00> : vector<2x128xf32>
    %10 = tpu.matmul %8, %9, %cst_8 {dimension_numbers = #tpu.dot_dimension_numbers<[1], [0], [0], [1], [0, 0, 1, 1], [], []>} : vector<2x128xbf16>, vector<128x128xbf16>, vector<2x128xf32> -> vector<2x128xf32>
    %c0_9 = arith.constant 0 : index
    %c0_10 = arith.constant 0 : index
    %11 = vector.load %arg5[%c0_9, %c0_10] : memref<1x128xf32, #tpu.memory_space<vmem>>, vector<1x128xf32>
    %12 = vector.broadcast %11 : vector<1x128xf32> to vector<2x128xf32>
    %13 = arith.addf %10, %12 : vector<2x128xf32>
    %cst_11 = arith.constant 0.000000e+00 : f32
    %14 = vector.broadcast %cst_11 : f32 to vector<2x128xf32>
    %15 = arith.maximumf %13, %14 : vector<2x128xf32>
    %16 = arith.truncf %15 : vector<2x128xf32> to vector<2x128xbf16>
    %c0_12 = arith.constant 0 : index
    %c0_13 = arith.constant 0 : index
    %17 = vector.load %arg6[%c0_12, %c0_13] : memref<128x128xbf16, #tpu.memory_space<vmem>>, vector<128x128xbf16>
    %cst_14 = arith.constant dense<0.000000e+00> : vector<2x128xf32>
    %18 = tpu.matmul %16, %17, %cst_14 {dimension_numbers = #tpu.dot_dimension_numbers<[1], [0], [0], [1], [0, 0, 1, 1], [], []>} : vector<2x128xbf16>, vector<128x128xbf16>, vector<2x128xf32> -> vector<2x128xf32>
    %c0_15 = arith.constant 0 : index
    %c0_16 = arith.constant 0 : index
    %19 = vector.load %arg7[%c0_15, %c0_16] : memref<1x128xf32, #tpu.memory_space<vmem>>, vector<1x128xf32>
    %20 = vector.broadcast %19 : vector<1x128xf32> to vector<2x128xf32>
    %21 = arith.addf %18, %20 : vector<2x128xf32>
    %c0_17 = arith.constant 0 : index
    %c0_18 = arith.constant 0 : index
    %22 = vector.load %arg8[%c0_17, %c0_18] : memref<2x128xf32, #tpu.memory_space<vmem>>, vector<2x128xf32>
    tpu.vector_store %arg8[%c0_17, %c0_18], %21 {strides = array<i32>} : memref<2x128xf32, #tpu.memory_space<vmem>>, vector<2x128xf32>,
    return
  }
  func.func @transform_0(%arg0: i32) -> (i32, i32) {
    %c0_i32 = arith.constant 0 : i32
    %c0_i32_0 = arith.constant 0 : i32
    return %arg0, %c0_i32 : i32, i32
  }
  func.func @transform_1(%arg0: i32) -> (i32, i32) {
    %c0_i32 = arith.constant 0 : i32
    %c0_i32_0 = arith.constant 0 : i32
    %c0_i32_1 = arith.constant 0 : i32
    return %c0_i32, %c0_i32_0 : i32, i32
  }
  func.func @transform_2(%arg0: i32) -> (i32, i32) {
    %c0_i32 = arith.constant 0 : i32
    %c0_i32_0 = arith.constant 0 : i32
    %c0_i32_1 = arith.constant 0 : i32
    return %c0_i32, %c0_i32_0 : i32, i32
  }
  func.func @transform_3(%arg0: i32) -> (i32, i32) {
    %c0_i32 = arith.constant 0 : i32
    %c0_i32_0 = arith.constant 0 : i32
    %c0_i32_1 = arith.constant 0 : i32
    return %c0_i32, %c0_i32_0 : i32, i32
  }
  func.func @transform_4(%arg0: i32) -> (i32, i32) {
    %c0_i32 = arith.constant 0 : i32
    %c0_i32_0 = arith.constant 0 : i32
    %c0_i32_1 = arith.constant 0 : i32
    return %c0_i32, %c0_i32_0 : i32, i32
  }
  func.func @transform_5(%arg0: i32) -> (i32, i32) {
    %c0_i32 = arith.constant 0 : i32
    %c0_i32_0 = arith.constant 0 : i32
    %c0_i32_1 = arith.constant 0 : i32
    return %c0_i32, %c0_i32_0 : i32, i32
  }
  func.func @transform_6(%arg0: i32) -> (i32, i32) {
    %c0_i32 = arith.constant 0 : i32
    %c0_i32_0 = arith.constant 0 : i32
    %c0_i32_1 = arith.constant 0 : i32
    return %c0_i32, %c0_i32_0 : i32, i32
  }
  func.func @transform_7(%arg0: i32) -> (i32, i32) {
    %c0_i32 = arith.constant 0 : i32
    %c0_i32_0 = arith.constant 0 : i32
    return %arg0, %c0_i32 : i32, i32
  }
}

</mosaic_0001>

<bundles_post_ra>
// kernel: net_forward.3
= control target key start
LH: loop header
LB: loop body
LE: loop exit
PB: predicated region body
PF: predicated region fallthrough
CT: control target
= control target key end

     0   :  { %s1054_s12 = smov 0   ;;  %s1056_s13 = smov 0   ;;  %s1256_s0 = inlined_call_operand.vmem [shape: bf16[320,512], index: 0, kind: input, shape index: {}]   ;;  %s1257_s1 = inlined_call_operand.vmem [shape: bf16[32,320], index: 1, kind: input, shape index: {}]   ;;  %s1258_s2 = inlined_call_operand.vmem [shape: f32[8,1], index: 2, kind: input, shape index: {}]   ;;  %s1259_s3 = inlined_call_operand.vmem [shape: bf16[8,512], index: 3, kind: output, shape index: {}]  }
   0x1   :  { %s1058_s14 = smov 0  }
   0x2 LB: > { %s843_s15 = sadd.s32 4294967295, %s1031_s14   ;;  %s1071_s16 = sadd.s32 1, %s1031_s14   ;;  %s1031_s14 = sphi %s1058_s14, %s1262_s14   ;;  %s1027_s13 = sphi %s1056_s13, %s1261_s13   ;;  %s1023_s12 = sphi %s1054_s12, %s1260_s12  }
   0x3   : > { %s17_s17 = ssub.s32 %s1031_s14, %s1071_s16  ;;  %s20_s18 = sadd.s32 1, %s1027_s13 }
   0x4   : > { %p18_p0 = scmp.eq.s32.totalorder %s17_s17, 0  ;;  %p27_p1 = scmp.ne.s32.totalorder %s1027_s13, %s1023_s12 }
   0x5   : > { %p28_p2 = scmp.eq.s32.totalorder %s1031_s14, 0  ;;  %p846_p4 = scmp.ge.s32.totalorder %s1031_s14, 2 }
   0x6   : > { %s1080_s19 = scalar_select %p18_p0, %s1027_s13, %s20_s18  }
   0x7   : > { %p29_p3 = por %p28_p2, %p27_p1  ;;  %127 = sbr.rel (%p846_p4) target bundleno = 38 (0x26), region = 24 }
   0xe   : > { %130 = sbr.rel (!%p29_p3) target bundleno = 38 (0x26), region = 28  ;;  %s132_s20 = sand.u32 (%p29_p3), 1, %s1027_s13  }
   0xf   : > { %s903_s21 = sshll.u32 (%p29_p3), %s1031_s14, 3  ;;  %s913_s22 = smul.u32 (%p29_p3), 320, %s132_s20 }
  0x10   : > { %s1088_s25 = scalar_lea.vmem (%p29_p3), %s1256_s0, %s903_s21 }
  0x11   : > { %v243_v0 = vld [vmem:[%s1088_s25] sm:$0xff] (%p29_p3)  ;;  %v245_v1 = vld [vmem:[%s1088_s25 + $0x10] sm:$0xff] (%p29_p3)  ;;  %s1096_s26 = scalar_lea.vmem (%p29_p3), [#allocation2], %s913_s22 }
  0x12   : > { %v247_v2 = vld [vmem:[%s1088_s25 + $0x20] sm:$0xff] (%p29_p3)  ;;  %v249_v3 = vld [vmem:[%s1088_s25 + $0x30] sm:$0xff] (%p29_p3)  ;;  %244 = vst [vmem:[%s1096_s26] sm:$0xff] (%p29_p3), %v243_v0  ;;  %246 = vst [vmem:[%s1096_s26 + $0x8] sm:$0xff] (%p29_p3), %v245_v1 }
  0x13   : > { %v251_v4 = vld [vmem:[%s1088_s25 + $0x40] sm:$0xff] (%p29_p3)  ;;  %v253_v5 = vld [vmem:[%s1088_s25 + $0x50] sm:$0xff] (%p29_p3)  ;;  %248 = vst [vmem:[%s1096_s26 + $0x10] sm:$0xff] (%p29_p3), %v247_v2  ;;  %250 = vst [vmem:[%s1096_s26 + $0x18] sm:$0xff] (%p29_p3), %v249_v3 }
  0x14   : > { %252 = vst [vmem:[%s1096_s26 + $0x20] sm:$0xff] (%p29_p3), %v251_v4  ;;  %254 = vst [vmem:[%s1096_s26 + $0x28] sm:$0xff] (%p29_p3), %v253_v5  ;;  %v255_v6 = vld [vmem:[%s1088_s25 + $0x60] sm:$0xff] (%p29_p3)  ;;  %v257_v7 = vld [vmem:[%s1088_s25 + $0x70] sm:$0xff] (%p29_p3) }
  0x15   : > { %v259_v8 = vld [vmem:[%s1088_s25 + $0x80] sm:$0xff]  ;;  %256 = vst [vmem:[%s1096_s26 + $0x30] sm:$0xff] %v255_v6  ;;  %258 = vst [vmem:[%s1096_s26 + $0x38] sm:$0xff] %v257_v7  ;;  %v261_v9 = vld [vmem:[%s1088_s25 + $0x90] sm:$0xff] }
  0x16   : > { %260 = vst [vmem:[%s1096_s26 + $0x40] sm:$0xff] %v259_v8  ;;  %v263_v10 = vld [vmem:[%s1088_s25 + $0xa0] sm:$0xff]  ;;  %v265_v11 = vld [vmem:[%s1088_s25 + $0xb0] sm:$0xff]  ;;  %262 = vst [vmem:[%s1096_s26 + $0x48] sm:$0xff] %v261_v9 }
  0x17   : > { %264 = vst [vmem:[%s1096_s26 + $0x50] sm:$0xff] %v263_v10  ;;  %266 = vst [vmem:[%s1096_s26 + $0x58] sm:$0xff] %v265_v11  ;;  %v267_v12 = vld [vmem:[%s1088_s25 + $0xc0] sm:$0xff]  ;;  %v269_v13 = vld [vmem:[%s1088_s25 + $0xd0] sm:$0xff] }
  0x18   : > { %v271_v14 = vld [vmem:[%s1088_s25 + $0xe0] sm:$0xff]  ;;  %268 = vst [vmem:[%s1096_s26 + $0x60] sm:$0xff] %v267_v12  ;;  %270 = vst [vmem:[%s1096_s26 + $0x68] sm:$0xff] %v269_v13  ;;  %v273_v15 = vld [vmem:[%s1088_s25 + $0xf0] sm:$0xff] }
  0x19   : > { %272 = vst [vmem:[%s1096_s26 + $0x70] sm:$0xff] %v271_v14  ;;  %v275_v16 = vld [vmem:[%s1088_s25 + $0x100] sm:$0xff]  ;;  %v277_v17 = vld [vmem:[%s1088_s25 + $0x110] sm:$0xff]  ;;  %274 = vst [vmem:[%s1096_s26 + $0x78] sm:$0xff] %v273_v15 }
  0x1a   : > { %276 = vst [vmem:[%s1096_s26 + $0x80] sm:$0xff] %v275_v16  ;;  %278 = vst [vmem:[%s1096_s26 + $0x88] sm:$0xff] %v277_v17  ;;  %v279_v18 = vld [vmem:[%s1088_s25 + $0x120] sm:$0xff]  ;;  %v281_v19 = vld [vmem:[%s1088_s25 + $0x130] sm:$0xff] }
  0x1b   : > { %v283_v20 = vld [vmem:[%s1088_s25 + $0x140] sm:$0xff]  ;;  %280 = vst [vmem:[%s1096_s26 + $0x90] sm:$0xff] %v279_v18  ;;  %282 = vst [vmem:[%s1096_s26 + $0x98] sm:$0xff] %v281_v19  ;;  %v285_v21 = vld [vmem:[%s1088_s25 + $0x150] sm:$0xff] }
  0x1c   : > { %284 = vst [vmem:[%s1096_s26 + $0xa0] sm:$0xff] %v283_v20  ;;  %v287_v22 = vld [vmem:[%s1088_s25 + $0x160] sm:$0xff]  ;;  %v289_v23 = vld [vmem:[%s1088_s25 + $0x170] sm:$0xff]  ;;  %286 = vst [vmem:[%s1096_s26 + $0xa8] sm:$0xff] %v285_v21 }
  0x1d   : > { %288 = vst [vmem:[%s1096_s26 + $0xb0] sm:$0xff] %v287_v22  ;;  %290 = vst [vmem:[%s1096_s26 + $0xb8] sm:$0xff] %v289_v23  ;;  %v291_v24 = vld [vmem:[%s1088_s25 + $0x180] sm:$0xff]  ;;  %v293_v25 = vld [vmem:[%s1088_s25 + $0x190] sm:$0xff] }
  0x1e   : > { %v295_v26 = vld [vmem:[%s1088_s25 + $0x1a0] sm:$0xff]  ;;  %292 = vst [vmem:[%s1096_s26 + $0xc0] sm:$0xff] %v291_v24  ;;  %294 = vst [vmem:[%s1096_s26 + $0xc8] sm:$0xff] %v293_v25  ;;  %v297_v27 = vld [vmem:[%s1088_s25 + $0x1b0] sm:$0xff] }
  0x1f   : > { %296 = vst [vmem:[%s1096_s26 + $0xd0] sm:$0xff] %v295_v26  ;;  %v299_v28 = vld [vmem:[%s1088_s25 + $0x1c0] sm:$0xff]  ;;  %v301_v29 = vld [vmem:[%s1088_s25 + $0x1d0] sm:$0xff]  ;;  %298 = vst [vmem:[%s1096_s26 + $0xd8] sm:$0xff] %v297_v27 }
  0x20   : > { %300 = vst [vmem:[%s1096_s26 + $0xe0] sm:$0xff] %v299_v28  ;;  %302 = vst [vmem:[%s1096_s26 + $0xe8] sm:$0xff] %v301_v29  ;;  %v303_v30 = vld [vmem:[%s1088_s25 + $0x1e0] sm:$0xff]  ;;  %v305_v31 = vld [vmem:[%s1088_s25 + $0x1f0] sm:$0xff] }
  0x21   : > { %v307_v32 = vld [vmem:[%s1088_s25 + $0x200] sm:$0xff]  ;;  %304 = vst [vmem:[%s1096_s26 + $0xf0] sm:$0xff] %v303_v30  ;;  %306 = vst [vmem:[%s1096_s26 + $0xf8] sm:$0xff] %v305_v31  ;;  %v309_v33 = vld [vmem:[%s1088_s25 + $0x210] sm:$0xff] }
  0x22   : > { %308 = vst [vmem:[%s1096_s26 + $0x100] sm:$0xff] %v307_v32  ;;  %v311_v34 = vld [vmem:[%s1088_s25 + $0x220] sm:$0xff]  ;;  %v313_v35 = vld [vmem:[%s1088_s25 + $0x230] sm:$0xff]  ;;  %310 = vst [vmem:[%s1096_s26 + $0x108] sm:$0xff] %v309_v33 }
  0x23   : > { %312 = vst [vmem:[%s1096_s26 + $0x110] sm:$0xff] %v311_v34  ;;  %314 = vst [vmem:[%s1096_s26 + $0x118] sm:$0xff] %v313_v35  ;;  %v315_v36 = vld [vmem:[%s1088_s25 + $0x240] sm:$0xff]  ;;  %v317_v37 = vld [vmem:[%s1088_s25 + $0x250] sm:$0xff] }
  0x24   : > { %v319_v38 = vld [vmem:[%s1088_s25 + $0x260] sm:$0xff]  ;;  %316 = vst [vmem:[%s1096_s26 + $0x120] sm:$0xff] %v315_v36  ;;  %318 = vst [vmem:[%s1096_s26 + $0x128] sm:$0xff] %v317_v37  ;;  %v321_v39 = vld [vmem:[%s1088_s25 + $0x270] sm:$0xff] }
  0x25   : > { %320 = vst [vmem:[%s1096_s26 + $0x130] sm:$0xff] %v319_v38  ;;  %322 = vst [vmem:[%s1096_s26 + $0x138] sm:$0xff] %v321_v39 }
  0x26 PF: > { %p849_p5 = scmp.ge.s32.totalorder %s1031_s14, 1  ;;  %p327_p6 = scmp.lt.s32.totalorder %s1031_s14, 3 }
  0x28   : > { %p328_p7 = pnand %p849_p5, %p327_p6 }
  0x29   : > { %s334_s27 = sand.u32 (!%p328_p7), 1, %s1023_s12   ;;  %v1033_v40 = vmov (!%p328_p7), 0   ;;  %v1004_v41 = vld [vmem:[%s1257_s1 + $0x4] ss:$12 sps:$4 sm:$0xff] (!%p328_p7)   ;;  %v1001_v4 = vld [vmem:[%s1257_s1 + $0x8] ss:$12 sps:$4 sm:$0xff] (!%p328_p7)  }
  0x2a   : > { %331 = sbr.rel (%p328_p7) target bundleno = 347 (0x15b), region = 66  ;;  %735 = vmatprep.mubr.bf16.mxu0 (!%p328_p7), %v1033_v40  ;;  %940 = vset.pattern.permute.xlu0 (!%p328_p7), %v1033_v40  ;;  %v762_v2 = vld [vmem:[%s1258_s2] sm:$0xff] (!%p328_p7)  ;;  %vm643_vm0 = vcmask (!%p328_p7), 523264   ;;  %v1006_v22 = vld [vmem:[%s1257_s1 + $0x1c] ss:$12 sps:$4 sm:$0xff] (!%p328_p7)   ;;  %s850_s22 = sshll.u32 (!%p328_p7), %s843_s15, 1 }
  0x2b   : > { %s914_s28 = smul.u32 (!%p328_p7), 320, %s334_s27  ;;  %682 = vmatprep.mubr.bf16.mxu1 (!%p328_p7), %v1004_v41  ;;  %765 = vperm.xlu0 (!%p328_p7), %940, %v762_v2   ;;  %v1005_v9 = vld [vmem:[%s1257_s1 + $0x20] ss:$12 sps:$4 sm:$0xff] (!%p328_p7)   ;;  %v1008_v23 = vld [vmem:[%s1257_s1 + $0x18] ss:$12 sps:$4 sm:$0xff] (!%p328_p7)   ;;  %p359_p8 = scmp.lt.s32.totalorder (!%p328_p7), %s850_s22, 3 }
  0x2c   : > { %v1002_v21 = vld [vmem:[%s1257_s1] ss:$12 sps:$4 sm:$0xff] (!%p328_p7)  }
  0x2d   : > { %s1180_s4 = scalar_lea.vmem (!%p328_p7), [#allocation2], %s914_s28 }
  0x2e   : > { %v941_v42 = vld [vmem:[%s1180_s4 + $0x4] ss:$8 sps:$4 sm:$0xff] (!%p328_p7)   ;;  %v943_v43 = vld [vmem:[%s1180_s4] ss:$8 sps:$4 sm:$0xff] (!%p328_p7)   ;;  %v944_v44 = vld [vmem:[%s1180_s4 + $0x14] ss:$8 sps:$4 sm:$0xff] (!%p328_p7)  }
  0x2f   : > { %650 = vmatprep.subr.bf16.mxu1 (!%p328_p7), %v941_v42  ;;  %v946_v45 = vld [vmem:[%s1180_s4 + $0x10] ss:$8 sps:$4 sm:$0xff] (!%p328_p7)   ;;  %v947_v46 = vld [vmem:[%s1180_s4 + $0x24] ss:$8 sps:$4 sm:$0xff] (!%p328_p7)   ;;  %v949_v47 = vld [vmem:[%s1180_s4 + $0x20] ss:$8 sps:$4 sm:$0xff] (!%p328_p7)  }
  0x30   : > { %651 = vmatpush1.bf16.msra.mxu1 (!%p328_p7), %v943_v43  ;;  %v950_v48 = vld [vmem:[%s1180_s4 + $0x34] ss:$8 sps:$4 sm:$0xff] (!%p328_p7)   ;;  %v952_v49 = vld [vmem:[%s1180_s4 + $0x30] ss:$8 sps:$4 sm:$0xff] (!%p328_p7)   ;;  %v953_v50 = vld [vmem:[%s1180_s4 + $0x44] ss:$8 sps:$4 sm:$0xff] (!%p328_p7)  }
  0x31   : > { %652 = vmatprep.subr.bf16.mxu1 %v944_v44  ;;  %v955_v51 = vld [vmem:[%s1180_s4 + $0x40] ss:$8 sps:$4 sm:$0xff]   ;;  %v956_v52 = vld [vmem:[%s1180_s4 + $0x54] ss:$8 sps:$4 sm:$0xff]   ;;  %v977_v53 = vld [vmem:[%s1180_s4 + $0x104] ss:$8 sps:$4 sm:$0xff]  }
  0x32   : > { %v979_v54 = vld [vmem:[%s1180_s4 + $0x100] ss:$8 sps:$4 sm:$0xff]   ;;  %v958_v55 = vld [vmem:[%s1180_s4 + $0x50] ss:$8 sps:$4 sm:$0xff]   ;;  %703 = vmatprep.subr.bf16.mxu0 %v977_v53  ;;  %v983_v56 = vld [vmem:[%s1180_s4 + $0x114] ss:$8 sps:$4 sm:$0xff]  }
  0x33   : > { %704 = vmatpush1.bf16.msra.mxu0 %v979_v54  ;;  %v985_v57 = vld [vmem:[%s1180_s4 + $0x110] ss:$8 sps:$4 sm:$0xff]   ;;  %v959_v58 = vld [vmem:[%s1180_s4 + $0x64] ss:$8 sps:$4 sm:$0xff]   ;;  %v961_v59 = vld [vmem:[%s1180_s4 + $0x60] ss:$8 sps:$4 sm:$0xff]  }
  0x34   : > { %653 = vmatpush1.bf16.msra.mxu1 %v946_v45  ;;  %705 = vmatprep.subr.bf16.mxu0 %v983_v56  ;;  %v989_v60 = vld [vmem:[%s1180_s4 + $0x124] ss:$8 sps:$4 sm:$0xff]   ;;  %v962_v61 = vld [vmem:[%s1180_s4 + $0x74] ss:$8 sps:$4 sm:$0xff]   ;;  %v991_v62 = vld [vmem:[%s1180_s4 + $0x120] ss:$8 sps:$4 sm:$0xff]  }
  0x35   : > { %654 = vmatprep.subr.bf16.mxu1 %v947_v46  ;;  %v995_v63 = vld [vmem:[%s1180_s4 + $0x134] ss:$8 sps:$4 sm:$0xff]   ;;  %v964_v0 = vld [vmem:[%s1180_s4 + $0x70] ss:$8 sps:$4 sm:$0xff]   ;;  %v965_v3 = vld [vmem:[%s1180_s4 + $0x84] ss:$8 sps:$4 sm:$0xff]  }
  0x36   : > { %v997_v1 = vld [vmem:[%s1180_s4 + $0x130] ss:$8 sps:$4 sm:$0xff]   ;;  %v967_v5 = vld [vmem:[%s1180_s4 + $0x80] ss:$8 sps:$4 sm:$0xff]   ;;  %v968_v6 = vld [vmem:[%s1180_s4 + $0x94] ss:$8 sps:$4 sm:$0xff]  }
  0x37   : > { %706 = vmatpush1.bf16.msra.mxu0 %v985_v57  ;;  %v970_v7 = vld [vmem:[%s1180_s4 + $0x90] ss:$8 sps:$4 sm:$0xff]   ;;  %v971_v8 = vld [vmem:[%s1180_s4 + $0xa4] ss:$8 sps:$4 sm:$0xff]   ;;  %v973_v10 = vld [vmem:[%s1180_s4 + $0xa0] ss:$8 sps:$4 sm:$0xff]  }
  0x38   : > { %655 = vmatpush1.bf16.msra.mxu1 %v949_v47  ;;  %707 = vmatprep.subr.bf16.mxu0 %v989_v60  ;;  %v974_v11 = vld [vmem:[%s1180_s4 + $0xb4] ss:$8 sps:$4 sm:$0xff]   ;;  %v976_v12 = vld [vmem:[%s1180_s4 + $0xb0] ss:$8 sps:$4 sm:$0xff]   ;;  %v980_v13 = vld [vmem:[%s1180_s4 + $0xc4] ss:$8 sps:$4 sm:$0xff]  }
  0x39   : > { %656 = vmatprep.subr.bf16.mxu1 %v950_v48  ;;  %v982_v14 = vld [vmem:[%s1180_s4 + $0xc0] ss:$8 sps:$4 sm:$0xff]   ;;  %v986_v15 = vld [vmem:[%s1180_s4 + $0xd4] ss:$8 sps:$4 sm:$0xff]   ;;  %v988_v16 = vld [vmem:[%s1180_s4 + $0xd0] ss:$8 sps:$4 sm:$0xff]  }
  0x3a   : > { %v992_v17 = vld [vmem:[%s1180_s4 + $0xe4] ss:$8 sps:$4 sm:$0xff]   ;;  %v994_v18 = vld [vmem:[%s1180_s4 + $0xe0] ss:$8 sps:$4 sm:$0xff]   ;;  %v998_v19 = vld [vmem:[%s1180_s4 + $0xf4] ss:$8 sps:$4 sm:$0xff]  }
  0x3b   : > { %708 = vmatpush1.bf16.msra.mxu0 %v991_v62  ;;  %v1000_v20 = vld [vmem:[%s1180_s4 + $0xf0] ss:$8 sps:$4 sm:$0xff]   ;;  %s1264_s22 = smov (!%p359_p8, %s850_s22), 3 }
  0x3c   : > { %657 = vmatpush1.bf16.msra.mxu1 %v952_v49  ;;  %709 = vmatprep.subr.bf16.mxu0 %v995_v63  ;;  %s851_s23 = sshll.u32 %s1264_s22, 2 }
  0x3d   : > { %658 = vmatprep.subr.bf16.mxu1 %v953_v50  ;;  %s362_s24 = scalar_lea.vmem %s1259_s3, %s851_s23 }
  0x3f   : > { %710 = vmatpush1.bf16.msra.mxu0 %v997_v1 }
  0x40   : > { %659 = vmatpush1.bf16.msra.mxu1 %v955_v51 }
  0x41   : > { %660 = vmatprep.subr.bf16.mxu1 %v956_v52 }
  0x42   : > { %898 = vmatmul.mubr.msk.bf16.vlgmr.msra.gmra.mrb[0].mxu0 %vm643_vm0, %v1001_v4 }
  0x43   : > { %745 = vmatprep.mubr.bf16.mxu0 %v1033_v40 }
  0x44   : > { %661 = vmatpush1.bf16.msra.mxu1 %v958_v55 }
  0x45   : > { %662 = vmatprep.subr.bf16.mxu1 %v959_v58 }
  0x48   : > { %663 = vmatpush1.bf16.msra.mxu1 %v961_v59 }
  0x49   : > { %664 = vmatprep.subr.bf16.mxu1 %v962_v61 }
  0x4a   : > { %899 = vmatmul.mubr.msk.bf16.gmra.mrb[4].mxu0 %vm643_vm0, %v1005_v9 }
  0x4c   : > { %665 = vmatpush1.bf16.msra.mxu1 %v964_v0 }
  0x4d   : > { %666 = vmatprep.subr.bf16.mxu1 %v965_v3 }
  0x50   : > { %667 = vmatpush1.bf16.msra.mxu1 %v967_v5 }
  0x51   : > { %668 = vmatprep.subr.bf16.mxu1 %v968_v6 }
  0x54   : > { %669 = vmatpush1.bf16.msra.mxu1 %v970_v7 }
  0x55   : > { %670 = vmatprep.subr.bf16.mxu1 %v971_v8 }
  0x58   : > { %671 = vmatpush1.bf16.msra.mxu1 %v973_v10 }
  0x59   : > { %672 = vmatprep.subr.bf16.mxu1 %v974_v11 }
  0x5c   : > { %673 = vmatpush1.bf16.msra.mxu1 %v976_v12 }
  0x5d   : > { %674 = vmatprep.subr.bf16.mxu1 %v980_v13 }
  0x60   : > { %675 = vmatpush1.bf16.msra.mxu1 %v982_v14 }
  0x61   : > { %676 = vmatprep.subr.bf16.mxu1 %v986_v15 }
  0x64   : > { %677 = vmatpush1.bf16.msra.mxu1 %v988_v16 }
  0x65   : > { %678 = vmatprep.subr.bf16.mxu1 %v992_v17 }
  0x68   : > { %679 = vmatpush1.bf16.msra.mxu1 %v994_v18 }
  0x69   : > { %680 = vmatprep.subr.bf16.mxu1 %v998_v19 }
  0x6c   : > { %681 = vmatpush1.bf16.msra.mxu1 %v1000_v20 }
  0x6f   : > { %683 = vmatmul.mubr.bf16.vlgmr.msra.gmra.mrb[0].mxu1 %v1002_v21 }
  0x70   : > { %692 = vmatprep.mubr.bf16.mxu1 %v1006_v22 }
  0x77   : > { %693 = vmatmul.mubr.bf16.gmra.mrb[4].mxu1 %v1008_v23 }
  0xaa   : > { %v766_v52 = vpop.permute.xlu0 %765 }
 0x115   : > { %v737_v24 = vpop.f32.mrb[0].mxu0 }
 0x116   : > { %v739_v25 = vpop.f32.mrb[1].mxu0 }
 0x117   : > { %v741_v26 = vpop.f32.mrb[2].mxu0 }
 0x118   : > { %v743_v27 = vpop.f32.mrb[3].mxu0 }
 0x11d   : > { %v747_v28 = vpop.f32.mrb[4].mxu0 }
 0x11e   : > { %v749_v29 = vpop.f32.mrb[5].mxu0 }
 0x11f   : > { %v751_v30 = vpop.f32.mrb[6].mxu0 }
 0x120   : > { %v753_v31 = vpop.f32.mrb[7].mxu0 }
 0x142   : > { %v684_v32 = vpop.f32.mrb[0].mxu1 }
 0x143   : > { %v738_v33 = vadd.f32 %v737_v24, %v684_v32  ;;  %v686_v34 = vpop.f32.mrb[1].mxu1 }
 0x144   : > { %v740_v35 = vadd.f32 %v739_v25, %v686_v34  ;;  %v688_v36 = vpop.f32.mrb[2].mxu1 }
 0x145   : > { %v742_v37 = vadd.f32 %v741_v26, %v688_v36  ;;  %v690_v38 = vpop.f32.mrb[3].mxu1 }
 0x146   : > { %v744_v39 = vadd.f32 %v743_v27, %v690_v38 }
 0x147   : > { %v756_v40 = vmax.f32 %v738_v33, %v742_v37 }
 0x148   : > { %v757_v41 = vmax.f32 %v740_v35, %v744_v39 }
 0x14a   : > { %v694_v42 = vpop.f32.mrb[4].mxu1 }
 0x14b   : > { %v748_v43 = vadd.f32 %v747_v28, %v694_v42  ;;  %v696_v44 = vpop.f32.mrb[5].mxu1 }
 0x14c   : > { %v750_v45 = vadd.f32 %v749_v29, %v696_v44  ;;  %v698_v46 = vpop.f32.mrb[6].mxu1 }
 0x14d   : > { %v752_v47 = vadd.f32 %v751_v30, %v698_v46  ;;  %v700_v48 = vpop.f32.mrb[7].mxu1 }
 0x14e   : > { %v754_v49 = vadd.f32 %v753_v31, %v700_v48 }
 0x14f   : > { %v758_v50 = vmax.f32 %v748_v43, %v752_v47 }
 0x150   : > { %v759_v51 = vmax.f32 %v750_v45, %v754_v49 }
 0x151   : > { %v760_v53 = vmax.f32 %v756_v40, %v758_v50 }
 0x152   : > { %v761_v54 = vmax.f32 %v757_v41, %v759_v51 }
 0x153   : > { %v768_v55 = vadd.f32 %v766_v52, %v760_v53 }
 0x154   : > { %v769_v56 = vadd.f32 %v766_v52, %v761_v54 }
 0x155   : > { %v770_v57 = vmax.f32 %v768_v55, 0.0 }
 0x156   : > { %v771_v58 = vmax.f32 %v769_v56, 0.0 }
 0x158   : > { %v904_v59 = vpack.c.bf16 %v771_v58, %v770_v57 }
 0x15a   : > { %780 = vst [vmem:[%s362_s24] sm:$0xff] %v904_v59 }
 0x15b PF: > { %p10_p9 = scmp.ge.s32.totalorder %s1071_s16, 4   ;;  %s1260_s12 = smov %s1027_s13 }
 0x15c   : > { %s1261_s13 = smov %s1080_s19  ;;  %s1262_s14 = smov %s1071_s16 }
 0x15d   :  { %12 = sbr.rel (!%p10_p9) target bundleno = 2 (0x2), region = 105 }

// kernel: net_forward.4
= control target key start
LH: loop header
LB: loop body
LE: loop exit
PB: predicated region body
PF: predicated region fallthrough
CT: control target
= control target key end

     0   :  { %v1233_v1 = vmov 0   ;;  %vm587_vm0 = vcmask 261120   ;;  %s1504_s0 = inlined_call_operand.vmem [shape: bf16[800,128], index: 0, kind: input, shape index: {}]   ;;  %s1505_s1 = inlined_call_operand.vmem [shape: bf16[64,800], index: 1, kind: input, shape index: {}]   ;;  %s1506_s2 = inlined_call_operand.vmem [shape: f32[16,1], index: 2, kind: input, shape index: {}]   ;;  %s1507_s3 = inlined_call_operand.vmem [shape: bf16[16,128], index: 3, kind: output, shape index: {}]  }
   0x1   :  { %v1143_v0 = vld [vmem:[%s1504_s0 + $0x40] sm:$0xff]   ;;  %1142 = vset.pattern.permute.xlu0 %v1233_v1  ;;  %v1147_v5 = vld [vmem:[%s1504_s0 + $0x48] sm:$0xff]   ;;  %v1151_v9 = vld [vmem:[%s1504_s0 + $0x50] sm:$0xff]  }
   0x2   :  { %v1144_v2 = vld [vmem:[%s1504_s0 + $0xc0] sm:$0xff]   ;;  %987 = vmatprep.subr.bf16.mxu0 %v1143_v0  ;;  %v1148_v6 = vld [vmem:[%s1504_s0 + $0xc8] sm:$0xff]   ;;  %v1152_v10 = vld [vmem:[%s1504_s0 + $0xd0] sm:$0xff]  }
   0x3   :  { %v1145_v3 = vld [vmem:[%s1504_s0] sm:$0xff]   ;;  %1027 = vmatprep.subr.bf16.mxu1 %v1144_v2  ;;  %v1149_v7 = vld [vmem:[%s1504_s0 + $0x8] sm:$0xff]   ;;  %v1153_v11 = vld [vmem:[%s1504_s0 + $0x10] sm:$0xff]  }
   0x4   :  { %v1146_v4 = vld [vmem:[%s1504_s0 + $0x80] sm:$0xff]   ;;  %988 = vmatpush3.bf16.msra.mxu0 %v1145_v3  ;;  %v1150_v8 = vld [vmem:[%s1504_s0 + $0x88] sm:$0xff]   ;;  %v1154_v12 = vld [vmem:[%s1504_s0 + $0x90] sm:$0xff]  }
   0x5   :  { %1028 = vmatpush3.bf16.msra.mxu1 %v1146_v4  ;;  %989 = vmatprep.subr.bf16.mxu0 %v1147_v5  ;;  %v1155_v13 = vld [vmem:[%s1504_s0 + $0x58] sm:$0xff]   ;;  %v1159_v17 = vld [vmem:[%s1504_s0 + $0x60] sm:$0xff]   ;;  %v1163_v21 = vld [vmem:[%s1504_s0 + $0x68] sm:$0xff]  }
   0x6   :  { %1029 = vmatprep.subr.bf16.mxu1 %v1148_v6  ;;  %v1156_v14 = vld [vmem:[%s1504_s0 + $0xd8] sm:$0xff]   ;;  %v1160_v18 = vld [vmem:[%s1504_s0 + $0xe0] sm:$0xff]   ;;  %v1164_v22 = vld [vmem:[%s1504_s0 + $0xe8] sm:$0xff]  }
   0x7   :  { %v1157_v15 = vld [vmem:[%s1504_s0 + $0x18] sm:$0xff]   ;;  %v1161_v19 = vld [vmem:[%s1504_s0 + $0x20] sm:$0xff]   ;;  %v1165_v23 = vld [vmem:[%s1504_s0 + $0x28] sm:$0xff]  }
   0x8   :  { %990 = vmatpush3.bf16.msra.mxu0 %v1149_v7  ;;  %v1158_v16 = vld [vmem:[%s1504_s0 + $0x98] sm:$0xff]   ;;  %v1162_v20 = vld [vmem:[%s1504_s0 + $0xa0] sm:$0xff]   ;;  %v1166_v24 = vld [vmem:[%s1504_s0 + $0xa8] sm:$0xff]  }
   0x9   :  { %1030 = vmatpush3.bf16.msra.mxu1 %v1150_v8  ;;  %991 = vmatprep.subr.bf16.mxu0 %v1151_v9  ;;  %v1167_v25 = vld [vmem:[%s1504_s0 + $0x70] sm:$0xff]   ;;  %v1171_v29 = vld [vmem:[%s1504_s0 + $0x78] sm:$0xff]   ;;  %v1177_v34 = vld [vmem:[%s1505_s1 + $0x4] ss:$28 sps:$4 sm:$0xff]  }
   0xa   :  { %1031 = vmatprep.subr.bf16.mxu1 %v1152_v10  ;;  %v1168_v26 = vld [vmem:[%s1504_s0 + $0xf0] sm:$0xff]   ;;  %v1172_v30 = vld [vmem:[%s1504_s0 + $0xf8] sm:$0xff]   ;;  %v1178_v35 = vld [vmem:[%s1505_s1 + $0x8] ss:$28 sps:$4 sm:$0xff]   ;;  %632 = vmatprep.mubr.bf16.mxu0 %v1177_v34 }
   0xb   :  { %v1169_v27 = vld [vmem:[%s1504_s0 + $0x30] sm:$0xff]   ;;  %v1173_v31 = vld [vmem:[%s1504_s0 + $0x38] sm:$0xff]   ;;  %v1180_v36 = vld [vmem:[%s1505_s1 + $0xc] ss:$28 sps:$4 sm:$0xff]  }
   0xc   :  { %992 = vmatpush3.bf16.msra.mxu0 %v1153_v11  ;;  %v1170_v28 = vld [vmem:[%s1504_s0 + $0xb0] sm:$0xff]   ;;  %v1174_v32 = vld [vmem:[%s1504_s0 + $0xb8] sm:$0xff]   ;;  %v1181_v37 = vld [vmem:[%s1504_s0 + $0x140] sm:$0xff]   ;;  %697 = vmatprep.mubr.bf16.mxu1 %v1180_v36 }
   0xd   :  { %1032 = vmatpush3.bf16.msra.mxu1 %v1154_v12  ;;  %993 = vmatprep.subr.bf16.mxu0 %v1155_v13  ;;  %v1175_v33 = vld [vmem:[%s1505_s1] ss:$28 sps:$4 sm:$0xff]   ;;  %v1183_v39 = vld [vmem:[%s1504_s0 + $0x148] sm:$0xff]   ;;  %v1189_v43 = vld [vmem:[%s1505_s1 + $0x38] ss:$28 sps:$4 sm:$0xff]  }
   0xe   :  { %1033 = vmatprep.subr.bf16.mxu1 %v1156_v14  ;;  %v1182_v38 = vld [vmem:[%s1504_s0 + $0x100] sm:$0xff]   ;;  %v1184_v40 = vld [vmem:[%s1504_s0 + $0x108] sm:$0xff]   ;;  %v1185_v41 = vld [vmem:[%s1505_s1 + $0x3c] ss:$28 sps:$4 sm:$0xff]  }
   0xf   :  { %v1187_v42 = vld [vmem:[%s1505_s1 + $0x44] ss:$28 sps:$4 sm:$0xff]   ;;  %v1191_v45 = vld [vmem:[%s1504_s0 + $0x150] sm:$0xff]   ;;  %v1193_v47 = vld [vmem:[%s1504_s0 + $0x158] sm:$0xff]  }
  0x10   :  { %994 = vmatpush3.bf16.msra.mxu0 %v1157_v15  ;;  %v1190_v44 = vld [vmem:[%s1505_s1 + $0x40] ss:$28 sps:$4 sm:$0xff]   ;;  %v1192_v46 = vld [vmem:[%s1504_s0 + $0x110] sm:$0xff]   ;;  %v1203_v55 = vld [vmem:[%s1504_s0 + $0x168] sm:$0xff]  }
  0x11   :  { %1034 = vmatpush3.bf16.msra.mxu1 %v1158_v16  ;;  %995 = vmatprep.subr.bf16.mxu0 %v1159_v17  ;;  %v1194_v48 = vld [vmem:[%s1504_s0 + $0x118] sm:$0xff]   ;;  %v1195_v49 = vld [vmem:[%s1505_s1 + $0x74] ss:$28 sps:$4 sm:$0xff]   ;;  %v1201_v52 = vld [vmem:[%s1504_s0 + $0x160] sm:$0xff]  }
  0x12   :  { %1035 = vmatprep.subr.bf16.mxu1 %v1160_v18  ;;  %v1197_v50 = vld [vmem:[%s1505_s1 + $0x7c] ss:$28 sps:$4 sm:$0xff]   ;;  %v1199_v51 = vld [vmem:[%s1505_s1 + $0x70] ss:$28 sps:$4 sm:$0xff]   ;;  %v1202_v54 = vld [vmem:[%s1504_s0 + $0x120] sm:$0xff]  }
  0x13   :  { %v1200_v53 = vld [vmem:[%s1505_s1 + $0x78] ss:$28 sps:$4 sm:$0xff]   ;;  %v1205_v56 = vld [vmem:[%s1505_s1 + $0xac] ss:$28 sps:$4 sm:$0xff]   ;;  %v1221_v3 = vld [vmem:[%s1504_s0 + $0x180] sm:$0xff]  }
  0x14   :  { %996 = vmatpush3.bf16.msra.mxu0 %v1161_v19  ;;  %v1207_v57 = vld [vmem:[%s1505_s1 + $0xb4] ss:$28 sps:$4 sm:$0xff]   ;;  %v1204_v58 = vld [vmem:[%s1504_s0 + $0x128] sm:$0xff]   ;;  %v1213_v63 = vld [vmem:[%s1504_s0 + $0x178] sm:$0xff]  }
  0x15   :  { %1036 = vmatpush3.bf16.msra.mxu1 %v1162_v20  ;;  %997 = vmatprep.subr.bf16.mxu0 %v1163_v21  ;;  %v1211_v59 = vld [vmem:[%s1504_s0 + $0x170] sm:$0xff]   ;;  %v1209_v60 = vld [vmem:[%s1505_s1 + $0xa8] ss:$28 sps:$4 sm:$0xff]   ;;  %v1220_v1 = vld [vmem:[%s1505_s1 + $0xbc] ss:$28 sps:$4 sm:$0xff]  }
  0x16   :  { %1037 = vmatprep.subr.bf16.mxu1 %v1164_v22  ;;  %v1210_v61 = vld [vmem:[%s1505_s1 + $0xb0] ss:$28 sps:$4 sm:$0xff]   ;;  %v1214_v2 = vld [vmem:[%s1504_s0 + $0x138] sm:$0xff]   ;;  %v866_v9 = vld [vmem:[%s1506_s2] sm:$0xff] }
  0x17   :  { %v1212_v62 = vld [vmem:[%s1504_s0 + $0x130] sm:$0xff]   ;;  %v1223_v6 = vld [vmem:[%s1505_s1 + $0x4c] ss:$28 sps:$4 sm:$0xff]   ;;  %870 = vperm.xlu0 %1142, %v866_v9   ;;  %v1228_v13 = vld [vmem:[%s1505_s1 + $0x84] ss:$28 sps:$4 sm:$0xff]  }
  0x18   :  { %998 = vmatpush3.bf16.msra.mxu0 %v1165_v23  ;;  %v1217_v0 = vld [vmem:[%s1505_s1 + $0x14] ss:$28 sps:$4 sm:$0xff]   ;;  %v1222_v8 = vld [vmem:[%s1504_s0 + $0x188] sm:$0xff]   ;;  %v1231_v15 = vld [vmem:[%s1505_s1 + $0x80] ss:$28 sps:$4 sm:$0xff]  }
  0x19   :  { %1038 = vmatpush3.bf16.msra.mxu1 %v1166_v24  ;;  %999 = vmatprep.subr.bf16.mxu0 %v1167_v25  ;;  %v1215_v4 = vld [vmem:[%s1505_s1 + $0x10] ss:$28 sps:$4 sm:$0xff]   ;;  %v1218_v5 = vld [vmem:[%s1505_s1 + $0xb8] ss:$28 sps:$4 sm:$0xff]   ;;  %v1226_v10 = vld [vmem:[%s1505_s1 + $0x48] ss:$28 sps:$4 sm:$0xff]  }
  0x1a   :  { %1039 = vmatprep.subr.bf16.mxu1 %v1168_v26  ;;  %v1225_v7 = vld [vmem:[%s1505_s1 + $0x18] ss:$28 sps:$4 sm:$0xff]   ;;  %v867_v11 = vld [vmem:[%s1506_s2 + $0x8] sm:$0xff]  ;;  %v1232_v16 = vld [vmem:[%s1505_s1 + $0xc0] ss:$28 sps:$4 sm:$0xff]  }
  0x1b   :  { %v1227_v12 = vld [vmem:[%s1505_s1 + $0x50] ss:$28 sps:$4 sm:$0xff]   ;;  %v1230_v14 = vld [vmem:[%s1505_s1 + $0x88] ss:$28 sps:$4 sm:$0xff]   ;;  %875 = vperm.xlu0 %1142, %v867_v11  }
  0x1c   :  { %1000 = vmatpush3.bf16.msra.mxu0 %v1169_v27 }
  0x1d   :  { %1040 = vmatpush3.bf16.msra.mxu1 %v1170_v28  ;;  %1001 = vmatprep.subr.bf16.mxu0 %v1171_v29 }
  0x1e   :  { %1041 = vmatprep.subr.bf16.mxu1 %v1172_v30 }
  0x20   :  { %1002 = vmatpush3.bf16.msra.mxu0 %v1173_v31 }
  0x21   :  { %1042 = vmatpush3.bf16.msra.mxu1 %v1174_v32  ;;  %1067 = vmatprep.subr.bf16.mxu0 %v1181_v37 }
  0x22   :  { %1125 = vmatprep.subr.bf16.mxu1 %v1181_v37 }
  0x23   :  { %633 = vmatmul.mubr.bf16.vlgmr.msra.gmra.mrb[0].mxu0 %v1175_v33 }
  0x24   :  { %698 = vmatmul.mubr.bf16.vlgmr.msra.gmra.mrb[0].mxu1 %v1178_v35  ;;  %1068 = vmatpush3.bf16.msra.mxu0 %v1182_v38 }
  0x25   :  { %1133 = vmatpush3.bf16.msra.mxu1 %v1182_v38  ;;  %1069 = vmatprep.subr.bf16.mxu0 %v1183_v39 }
  0x26   :  { %1126 = vmatprep.subr.bf16.mxu1 %v1183_v39  ;;  %640 = vmatprep.mubr.bf16.mxu0 %v1185_v41 }
  0x27   :  { %705 = vmatprep.mubr.bf16.mxu1 %v1187_v42 }
  0x28   :  { %1070 = vmatpush3.bf16.msra.mxu0 %v1184_v40 }
  0x29   :  { %1134 = vmatpush3.bf16.msra.mxu1 %v1184_v40  ;;  %1071 = vmatprep.subr.bf16.mxu0 %v1191_v45 }
  0x2a   :  { %1127 = vmatprep.subr.bf16.mxu1 %v1191_v45 }
  0x2b   :  { %641 = vmatmul.mubr.bf16.gmra.mrb[4].mxu0 %v1189_v43 }
  0x2c   :  { %706 = vmatmul.mubr.bf16.gmra.mrb[4].mxu1 %v1190_v44  ;;  %1072 = vmatpush3.bf16.msra.mxu0 %v1192_v46 }
  0x2d   :  { %1135 = vmatpush3.bf16.msra.mxu1 %v1192_v46  ;;  %1073 = vmatprep.subr.bf16.mxu0 %v1193_v47 }
  0x2e   :  { %1128 = vmatprep.subr.bf16.mxu1 %v1193_v47  ;;  %648 = vmatprep.mubr.bf16.mxu0 %v1195_v49 }
  0x2f   :  { %713 = vmatprep.mubr.bf16.mxu1 %v1197_v50 }
  0x30   :  { %1074 = vmatpush3.bf16.msra.mxu0 %v1194_v48 }
  0x31   :  { %1136 = vmatpush3.bf16.msra.mxu1 %v1194_v48  ;;  %1075 = vmatprep.subr.bf16.mxu0 %v1201_v52 }
  0x32   :  { %1129 = vmatprep.subr.bf16.mxu1 %v1201_v52 }
  0x33   :  { %649 = vmatmul.mubr.bf16.gmra.mrb[8].mxu0 %v1199_v51 }
  0x34   :  { %714 = vmatmul.mubr.bf16.gmra.mrb[8].mxu1 %v1200_v53  ;;  %1076 = vmatpush3.bf16.msra.mxu0 %v1202_v54 }
  0x35   :  { %656 = vmatprep.mubr.bf16.mxu0 %v1205_v56  ;;  %1137 = vmatpush3.bf16.msra.mxu1 %v1202_v54 }
  0x36   :  { %1077 = vmatprep.subr.bf16.mxu0 %v1203_v55  ;;  %1130 = vmatprep.subr.bf16.mxu1 %v1203_v55 }
  0x37   :  { %721 = vmatprep.mubr.bf16.mxu1 %v1207_v57 }
  0x38   :  { %1078 = vmatpush3.bf16.msra.mxu0 %v1204_v58 }
  0x39   :  { %1138 = vmatpush3.bf16.msra.mxu1 %v1204_v58  ;;  %1079 = vmatprep.subr.bf16.mxu0 %v1211_v59 }
  0x3a   :  { %1131 = vmatprep.subr.bf16.mxu1 %v1211_v59 }
  0x3b   :  { %657 = vmatmul.mubr.bf16.gmra.mrb[12].mxu0 %v1209_v60 }
  0x3c   :  { %722 = vmatmul.mubr.bf16.gmra.mrb[12].mxu1 %v1210_v61  ;;  %762 = vmatprep.mubr.bf16.mxu0 %v1217_v0 }
  0x3d   :  { %1080 = vmatpush3.bf16.msra.mxu0 %v1212_v62  ;;  %1139 = vmatpush3.bf16.msra.mxu1 %v1212_v62 }
  0x3e   :  { %1081 = vmatprep.subr.bf16.mxu0 %v1213_v63  ;;  %1132 = vmatprep.subr.bf16.mxu1 %v1213_v63 }
  0x3f   :  { %786 = vmatprep.mubr.bf16.mxu1 %v1220_v1 }
  0x41   :  { %1082 = vmatpush3.bf16.msra.mxu0 %v1214_v2  ;;  %1140 = vmatpush3.bf16.msra.mxu1 %v1214_v2 }
  0x42   :  { %1113 = vmatprep.subr.bf16.mxu1 %v1221_v3 }
  0x44   :  { %763 = vmatmul.mubr.bf16.vlgmr.msra.gmra.mrb[16].mxu0 %v1215_v4  ;;  %787 = vmatmul.mubr.bf16.vlgmr.msra.gmra.mrb[16].mxu1 %v1218_v5 }
  0x45   :  { %770 = vmatprep.mubr.bf16.mxu0 %v1223_v6  ;;  %1114 = vmatpush3.bf16.msra.mxu1 %v1221_v3 }
  0x46   :  { %1117 = vmatprep.mubr.msk.bf16.mxu1 %vm587_vm0, %v1225_v7  ;;  %1115 = vmatprep.subr.bf16.mxu1 %v1222_v8 }
  0x49   :  { %1116 = vmatpush3.bf16.msra.mxu1 %v1222_v8 }
  0x4c   :  { %771 = vmatmul.mubr.bf16.gmra.mrb[20].mxu0 %v1226_v10  ;;  %1118 = vmatmul.mubr.msk.bf16.vlgmr.msra.gmra.mrb[20].mxu1 %vm587_vm0, %v1227_v12 }
  0x4d   :  { %778 = vmatprep.mubr.bf16.mxu0 %v1228_v13  ;;  %1121 = vmatprep.mubr.msk.bf16.mxu1 %vm587_vm0, %v1230_v14 }
  0x54   :  { %779 = vmatmul.mubr.bf16.gmra.mrb[24].mxu0 %v1231_v15  ;;  %1122 = vmatmul.mubr.msk.bf16.gmra.mrb[24].mxu1 %vm587_vm0, %v1232_v16 }
  0xf6   :  { %v1003_v17 = vpop.f32.mrb[0].mxu0 }
  0xf7   :  { %v1043_v18 = vpop.f32.mrb[0].mxu1  ;;  %v1004_v19 = vpop.f32.mrb[1].mxu0 }
  0xf8   :  { %v1005_v20 = vadd.f32 %v1004_v19, %v1003_v17  ;;  %v1044_v21 = vpop.f32.mrb[1].mxu1  ;;  %v1006_v22 = vpop.f32.mrb[2].mxu0 }
  0xf9   :  { %v1045_v23 = vadd.f32 %v1044_v21, %v1043_v18  ;;  %v1046_v24 = vpop.f32.mrb[2].mxu1  ;;  %v1007_v25 = vpop.f32.mrb[3].mxu0 }
  0xfa   :  { %v1008_v26 = vadd.f32 %v1007_v25, %v1006_v22  ;;  %v1047_v27 = vpop.f32.mrb[3].mxu1 }
  0xfb   :  { %v700_v28 = vadd.f32 %v1045_v23, %v1005_v20  ;;  %v1048_v29 = vadd.f32 %v1047_v27, %v1046_v24 }
  0xfd   :  { %v703_v30 = vadd.f32 %v1048_v29, %v1008_v26 }
  0xfe   :  { %v1009_v31 = vpop.f32.mrb[4].mxu0 }
  0xff   :  { %v1049_v32 = vpop.f32.mrb[4].mxu1  ;;  %v1010_v33 = vpop.f32.mrb[5].mxu0 }
 0x100   :  { %v1011_v34 = vadd.f32 %v1010_v33, %v1009_v31  ;;  %v1050_v35 = vpop.f32.mrb[5].mxu1  ;;  %v1012_v36 = vpop.f32.mrb[6].mxu0 }
 0x101   :  { %v1051_v37 = vadd.f32 %v1050_v35, %v1049_v32  ;;  %v1052_v38 = vpop.f32.mrb[6].mxu1  ;;  %v1013_v39 = vpop.f32.mrb[7].mxu0 }
 0x102   :  { %v1014_v40 = vadd.f32 %v1013_v39, %v1012_v36  ;;  %v1053_v41 = vpop.f32.mrb[7].mxu1 }
 0x103   :  { %v708_v42 = vadd.f32 %v1051_v37, %v1011_v34  ;;  %v1054_v43 = vadd.f32 %v1053_v41, %v1052_v38 }
 0x105   :  { %v711_v44 = vadd.f32 %v1054_v43, %v1014_v40 }
 0x106   :  { %v1015_v45 = vpop.f32.mrb[8].mxu0 }
 0x107   :  { %v1055_v46 = vpop.f32.mrb[8].mxu1  ;;  %v1016_v47 = vpop.f32.mrb[9].mxu0 }
 0x108   :  { %v1017_v48 = vadd.f32 %v1016_v47, %v1015_v45  ;;  %v1056_v49 = vpop.f32.mrb[9].mxu1  ;;  %v1018_v50 = vpop.f32.mrb[10].mxu0 }
 0x109   :  { %v1057_v51 = vadd.f32 %v1056_v49, %v1055_v46  ;;  %v1058_v52 = vpop.f32.mrb[10].mxu1  ;;  %v1019_v53 = vpop.f32.mrb[11].mxu0 }
 0x10a   :  { %v1020_v54 = vadd.f32 %v1019_v53, %v1018_v50  ;;  %v1059_v55 = vpop.f32.mrb[11].mxu1 }
 0x10b   :  { %v716_v56 = vadd.f32 %v1057_v51, %v1017_v48  ;;  %v1060_v57 = vadd.f32 %v1059_v55, %v1058_v52 }
 0x10d   :  { %v1498_v58 = vadd.f32 %v1060_v57, %v1020_v54 }
 0x10e   :  { %v1021_v59 = vpop.f32.mrb[12].mxu0 }
 0x10f   :  { %v1061_v60 = vpop.f32.mrb[12].mxu1  ;;  %v1022_v61 = vpop.f32.mrb[13].mxu0 }
 0x110   :  { %v1023_v62 = vadd.f32 %v1022_v61, %v1021_v59  ;;  %v1062_v63 = vpop.f32.mrb[13].mxu1  ;;  %v1024_v0 = vpop.f32.mrb[14].mxu0 }
 0x111   :  { %v1063_v1 = vadd.f32 %v1062_v63, %v1061_v60  ;;  %v1064_v2 = vpop.f32.mrb[14].mxu1  ;;  %v1025_v3 = vpop.f32.mrb[15].mxu0 }
 0x112   :  { %v1026_v4 = vadd.f32 %v1025_v3, %v1024_v0  ;;  %v1065_v5 = vpop.f32.mrb[15].mxu1 }
 0x113   :  { %v724_v6 = vadd.f32 %v1063_v1, %v1023_v62  ;;  %v1066_v7 = vadd.f32 %v1065_v5, %v1064_v2 }
 0x115   :  { %v727_v8 = vadd.f32 %v1066_v7, %v1026_v4 }
 0x117   :  { %v1083_v9 = vpop.f32.mrb[16].mxu0  ;;  %v1101_v10 = vpop.f32.mrb[16].mxu1 }
 0x118   :  { %v1084_v11 = vpop.f32.mrb[17].mxu0  ;;  %v1102_v13 = vpop.f32.mrb[17].mxu1 }
 0x119   :  { %v1085_v12 = vadd.f32 %v1084_v11, %v1083_v9  ;;  %v1086_v14 = vpop.f32.mrb[18].mxu0  ;;  %v1103_v15 = vadd.f32 %v1102_v13, %v1101_v10  ;;  %v1104_v16 = vpop.f32.mrb[18].mxu1 }
 0x11a   :  { %v1087_v17 = vpop.f32.mrb[19].mxu0  ;;  %v1105_v19 = vpop.f32.mrb[19].mxu1 }
 0x11b   :  { %v1088_v18 = vadd.f32 %v1087_v17, %v1086_v14  ;;  %v765_v20 = vadd.f32 %v1085_v12, %v700_v28  ;;  %v1106_v21 = vadd.f32 %v1105_v19, %v1104_v16  ;;  %v789_v22 = vadd.f32 %v1103_v15, %v724_v6 }
 0x11d   :  { %v768_v23 = vadd.f32 %v1088_v18, %v703_v30  ;;  %v792_v24 = vadd.f32 %v1106_v21, %v727_v8 }
 0x11f   :  { %v1089_v25 = vpop.f32.mrb[20].mxu0  ;;  %v1119_v26 = vpop.f32.mrb[20].mxu1 }
 0x120   :  { %v1090_v27 = vpop.f32.mrb[21].mxu0  ;;  %v829_v31 = vpop.f32.mrb[21].mxu1 }
 0x121   :  { %v1091_v29 = vadd.f32 %v1090_v27, %v1089_v25  ;;  %v1092_v32 = vpop.f32.mrb[22].mxu0  ;;  %v830_v33 = vadd.f32 %v829_v31, %v765_v20  ;;  %v1120_v34 = vpop.f32.mrb[22].mxu1 }
 0x122   :  { %v1093_v35 = vpop.f32.mrb[23].mxu0  ;;  %v832_v38 = vpop.f32.mrb[23].mxu1 }
 0x123   :  { %v773_v36 = vadd.f32 %v1091_v29, %v708_v42  ;;  %v1094_v37 = vadd.f32 %v1093_v35, %v1092_v32  ;;  %v833_v39 = vadd.f32 %v832_v38, %v768_v23 }
 0x125   :  { %v838_v40 = vadd.f32 %v1119_v26, %v773_v36  ;;  %v776_v41 = vadd.f32 %v1094_v37, %v711_v44  ;;  %v871_v44 = vpop.permute.xlu0 %870 }
 0x127   :  { %v860_v28 = vmax.f32 %v830_v33, %v838_v40  ;;  %v841_v43 = vadd.f32 %v1120_v34, %v776_v41  ;;  %v1095_v45 = vpop.f32.mrb[24].mxu0  ;;  %v1123_v30 = vpop.f32.mrb[24].mxu1 }
 0x128   :  { %v1096_v46 = vpop.f32.mrb[25].mxu0  ;;  %v854_v48 = vadd.f32 %v1123_v30, %v789_v22  ;;  %v845_v50 = vpop.f32.mrb[25].mxu1 }
 0x129   :  { %v861_v47 = vmax.f32 %v833_v39, %v841_v43  ;;  %v1097_v49 = vadd.f32 %v1096_v46, %v1095_v45  ;;  %v1098_v51 = vpop.f32.mrb[26].mxu0  ;;  %v1124_v52 = vpop.f32.mrb[26].mxu1 }
 0x12a   :  { %v1099_v53 = vpop.f32.mrb[27].mxu0  ;;  %v857_v55 = vadd.f32 %v1124_v52, %v792_v24  ;;  %v848_v57 = vpop.f32.mrb[27].mxu1 }
 0x12b   :  { %v781_v54 = vadd.f32 %v1097_v49, %v716_v56  ;;  %v1100_v42 = vadd.f32 %v1099_v53, %v1098_v51  ;;  %v876_v3 = vpop.permute.xlu0 %875 }
 0x12d   :  { %v846_v59 = vadd.f32 %v845_v50, %v781_v54  ;;  %v784_v60 = vadd.f32 %v1100_v42, %v1498_v58 }
 0x12f   :  { %v862_v61 = vmax.f32 %v846_v59, %v854_v48  ;;  %v849_v62 = vadd.f32 %v848_v57, %v784_v60 }
 0x131   :  { %v863_v63 = vmax.f32 %v849_v62, %v857_v55  ;;  %v864_v0 = vmax.f32 %v860_v28, %v862_v61 }
 0x133   :  { %v878_v1 = vadd.f32 %v871_v44, %v864_v0  ;;  %v865_v2 = vmax.f32 %v861_v47, %v863_v63 }
 0x135   :  { %v879_v4 = vadd.f32 %v876_v3, %v865_v2  ;;  %v880_v5 = vmax.f32 %v878_v1, 0.0 }
 0x137   :  { %v881_v6 = vmax.f32 %v879_v4, 0.0 }
 0x139   :  { %v985_v7 = vpack.c.bf16 %v881_v6, %v880_v5 }
 0x13b   :  { %986 = vst [vmem:[%s1507_s3] sm:$0xff] %v985_v7  }

// kernel: net_forward.5
= control target key start
LH: loop header
LB: loop body
LE: loop exit
PB: predicated region body
PF: predicated region fallthrough
CT: control target
= control target key end

     0   :  { %v785_v1 = vmov 0   ;;  %v98_v20 = vlaneseq  ;;  %v786_v25 = vmov 1966171168   ;;  %vm264_vm0 = vcmask 130048   ;;  %s1004_s0 = inlined_call_operand.vmem [shape: bf16[2,400], index: 0, kind: input, shape index: {}]   ;;  %s1005_s1 = inlined_call_operand.vmem [shape: bf16[400,128], index: 1, kind: input, shape index: {}]   ;;  %s1006_s2 = inlined_call_operand.vmem [shape: f32[1,128], index: 2, kind: input, shape index: {}]   ;;  %s1007_s3 = inlined_call_operand.vmem [shape: bf16[128,128], index: 3, kind: input, shape index: {}]   ;;  %s1008_s4 = inlined_call_operand.vmem [shape: f32[1,128], index: 4, kind: input, shape index: {}]   ;;  %s1009_s5 = inlined_call_operand.vmem [shape: bf16[128,128], index: 5, kind: input, shape index: {}]   ;;  %s1010_s6 = inlined_call_operand.vmem [shape: f32[1,128], index: 6, kind: input, shape index: {}]   ;;  %s1011_s7 = inlined_call_operand.hbm [shape: f32[2,128], index: 7, kind: output, shape index: {}]  }
   0x1   :  { %v720_v0 = vld [vmem:[%s1005_s1 + $0x40] sm:$0xff]   ;;  %308 = vmatprep.subr.bf16.mxu1 %v785_v1  ;;  %v723_v4 = vld [vmem:[%s1005_s1 + $0x48] sm:$0xff]   ;;  %v726_v7 = vld [vmem:[%s1005_s1 + $0x50] sm:$0xff]   ;;  %v96_v26 = vunpack.c.l.s4 %v786_v25  ;;  %v787_v38 = vmov 0.0  }
   0x2   :  { %v721_v2 = vld [vmem:[%s1005_s1 + $0x80] sm:$0xff]   ;;  %635 = vmatprep.subr.bf16.mxu0 %v720_v0  ;;  %v724_v5 = vld [vmem:[%s1005_s1 + $0x88] sm:$0xff]   ;;  %v727_v8 = vld [vmem:[%s1005_s1 + $0x90] sm:$0xff]   ;;  %v99_v27 = vshrl.u32 %v98_v20, 7 }
   0x3   :  { %v722_v3 = vld [vmem:[%s1005_s1] sm:$0xff]   ;;  %309 = vmatpush1.bf16.msra.mxu1 %v721_v2  ;;  %v725_v6 = vld [vmem:[%s1005_s1 + $0x8] sm:$0xff]   ;;  %v728_v9 = vld [vmem:[%s1005_s1 + $0x10] sm:$0xff]   ;;  %v97_v30 = vunpack.c.0.s8 %v96_v26 }
   0x4   :  { %636 = vmatpush3.bf16.msra.mxu0 %v722_v3  ;;  %310 = vmatprep.subr.bf16.mxu1 %v785_v1  ;;  %v729_v10 = vld [vmem:[%s1005_s1 + $0x58] sm:$0xff]   ;;  %v732_v13 = vld [vmem:[%s1005_s1 + $0x60] sm:$0xff]   ;;  %v735_v16 = vld [vmem:[%s1005_s1 + $0x68] sm:$0xff]  }
   0x5   :  { %637 = vmatprep.subr.bf16.mxu0 %v723_v4  ;;  %v730_v11 = vld [vmem:[%s1005_s1 + $0x98] sm:$0xff]   ;;  %v733_v14 = vld [vmem:[%s1005_s1 + $0xa0] sm:$0xff]   ;;  %v736_v17 = vld [vmem:[%s1005_s1 + $0xa8] sm:$0xff]   ;;  %v100_v32 = vsub.s32 %v97_v30, %v99_v27 }
   0x6   :  { %v731_v12 = vld [vmem:[%s1005_s1 + $0x18] sm:$0xff]   ;;  %v734_v15 = vld [vmem:[%s1005_s1 + $0x20] sm:$0xff]   ;;  %v737_v18 = vld [vmem:[%s1005_s1 + $0x28] sm:$0xff]  }
   0x7   :  { %311 = vmatpush1.bf16.msra.mxu1 %v724_v5  ;;  %v738_v19 = vld [vmem:[%s1005_s1 + $0x70] sm:$0xff]   ;;  %v590_v23 = vld.sshfl [vmem:[%s1004_s0] sm:$0x33 pattern:$0x75316420]  ;;  %v741_v24 = vld [vmem:[%s1005_s1 + $0x78] sm:$0xff]  }
   0x8   :  { %638 = vmatpush3.bf16.msra.mxu0 %v725_v6  ;;  %312 = vmatprep.subr.bf16.mxu1 %v785_v1  ;;  %v739_v21 = vld [vmem:[%s1005_s1 + $0xb0] sm:$0xff]   ;;  %v742_v28 = vld [vmem:[%s1005_s1 + $0xb8] sm:$0xff]   ;;  %v94_v29 = vcombine.high %v590_v23, %v590_v23  ;;  %v744_v33 = vld [vmem:[%s1005_s1 + $0xc0] sm:$0xff]   ;;  %v101_v36 = vrot.slane %v590_v23, %v100_v32 }
   0x9   :  { %639 = vmatprep.subr.bf16.mxu0 %v726_v7  ;;  %v740_v22 = vld [vmem:[%s1005_s1 + $0x30] sm:$0xff]   ;;  %v743_v31 = vld [vmem:[%s1005_s1 + $0x38] sm:$0xff]   ;;  %v745_v34 = vld [vmem:[%s1007_s3] sm:$0xff]  }
   0xa   :  { %v108_v35 = vrot.slane %v94_v29, %v100_v32  ;;  %v109_v39 = vcombine.high %v101_v36, %v101_v36  ;;  %v746_v40 = vld [vmem:[%s1007_s3 + $0x8] sm:$0xff]  }
   0xb   :  { %313 = vmatpush1.bf16.msra.mxu1 %v727_v8 }
   0xc   :  { %640 = vmatpush3.bf16.msra.mxu0 %v728_v9  ;;  %314 = vmatprep.subr.bf16.mxu1 %v785_v1  ;;  %v110_v37 = vcombine.high %v108_v35, %v108_v35 }
   0xd   :  { %641 = vmatprep.subr.bf16.mxu0 %v729_v10  ;;  %300 = vmatprep.mubr.bf16.mxu0 %v108_v35 }
   0xe   :  { %616 = vmatprep.mubr.msk.bf16.mxu1 %vm264_vm0, %v110_v37 }
   0xf   :  { %315 = vmatpush1.bf16.msra.mxu1 %v730_v11 }
  0x10   :  { %642 = vmatpush3.bf16.msra.mxu0 %v731_v12  ;;  %316 = vmatprep.subr.bf16.mxu1 %v785_v1 }
  0x11   :  { %643 = vmatprep.subr.bf16.mxu0 %v732_v13 }
  0x13   :  { %317 = vmatpush1.bf16.msra.mxu1 %v733_v14 }
  0x14   :  { %644 = vmatpush3.bf16.msra.mxu0 %v734_v15  ;;  %318 = vmatprep.subr.bf16.mxu1 %v785_v1 }
  0x15   :  { %645 = vmatprep.subr.bf16.mxu0 %v735_v16 }
  0x17   :  { %319 = vmatpush1.bf16.msra.mxu1 %v736_v17 }
  0x18   :  { %646 = vmatpush3.bf16.msra.mxu0 %v737_v18  ;;  %320 = vmatprep.subr.bf16.mxu1 %v785_v1 }
  0x19   :  { %647 = vmatprep.subr.bf16.mxu0 %v738_v19 }
  0x1b   :  { %321 = vmatpush1.bf16.msra.mxu1 %v739_v21 }
  0x1c   :  { %648 = vmatpush3.bf16.msra.mxu0 %v740_v22  ;;  %322 = vmatprep.subr.bf16.mxu1 %v785_v1 }
  0x1d   :  { %649 = vmatprep.subr.bf16.mxu0 %v741_v24 }
  0x1f   :  { %323 = vmatpush1.bf16.msra.mxu1 %v742_v28 }
  0x20   :  { %650 = vmatpush3.bf16.msra.mxu0 %v743_v31  ;;  %324 = vmatprep.subr.bf16.mxu1 %v785_v1 }
  0x21   :  { %675 = vmatprep.subr.bf16.mxu0 %v787_v38 }
  0x23   :  { %301 = vmatmul.mubr.bf16.vlgmr.msra.gmra.mrb[0].mxu0 %v101_v36  ;;  %325 = vmatpush1.bf16.msra.mxu1 %v744_v33 }
  0x24   :  { %676 = vmatpush3.bf16.msra.mxu0 %v745_v34  ;;  %695 = vmatprep.subr.bf16.mxu1 %v787_v38 }
  0x25   :  { %677 = vmatprep.subr.bf16.mxu0 %v787_v38 }
  0x26   :  { %341 = vmatmul.mubr.bf16.vlgmr.msra.gmra.mrb[0].mxu1 %v109_v39 }
  0x27   :  { %12 = vsyncpa [#allocation3], 0  ;;  %v747_v41 = vld [vmem:[%s1007_s3 + $0x10] sm:$0xff]   ;;  %v748_v42 = vld [vmem:[%s1007_s3 + $0x18] sm:$0xff]   ;;  %vm788_vm1 = vmmov 0   ;;  %s789_s16 = smov [#allocation2]  }
  0x28   :  { %678 = vmatpush3.bf16.msra.mxu0 %v746_v40  ;;  %v749_v43 = vld [vmem:[%s1007_s3 + $0x20] sm:$0xff]   ;;  %v750_v44 = vld [vmem:[%s1007_s3 + $0x28] sm:$0xff]   ;;  %v751_v45 = vld [vmem:[%s1007_s3 + $0x30] sm:$0xff]   ;;  %691 = vmatprep.mubr.msk.bf16.mxu0 %vm788_vm1, %v787_v38  ;;  %s581_s17 = sshll.u32 %s789_s16, 4  ;;  %s582_s17 = int_to_ptr.vmem [resolvable:$true] %s581_s17 }
  0x29   :  { %679 = vmatprep.subr.bf16.mxu0 %v787_v38  ;;  %v752_v46 = vld [vmem:[%s1007_s3 + $0x38] sm:$0xff]   ;;  %711 = vmatprep.mubr.msk.bf16.mxu1 %vm788_vm1, %v787_v38  ;;  %v753_v47 = vld [vmem:[%s1009_s5] sm:$0xff]   ;;  %v754_v48 = vld [vmem:[%s1009_s5 + $0x8] sm:$0xff]   ;;  %p766_p1 = scmp.lt.s32.totalorder %s582_s17, %s582_s17 }
  0x2a   :  { %696 = vmatpush3.bf16.msra.mxu1 %v753_v47  ;;  %v755_v49 = vld [vmem:[%s1009_s5 + $0x10] sm:$0xff]   ;;  %v756_v50 = vld [vmem:[%s1009_s5 + $0x18] sm:$0xff]   ;;  %v757_v51 = vld [vmem:[%s1009_s5 + $0x20] sm:$0xff]  }
  0x2b   :  { %697 = vmatprep.subr.bf16.mxu1 %v787_v38  ;;  %v758_v52 = vld [vmem:[%s1009_s5 + $0x28] sm:$0xff]   ;;  %v589_v55 = vld [vmem:[%s1006_s2] ss:$0 sm:$0xff]  ;;  %v759_v3 = vld [vmem:[%s1009_s5 + $0x30] sm:$0xff]  }
  0x2c   :  { %680 = vmatpush3.bf16.msra.mxu0 %v747_v41  ;;  %v760_v4 = vld [vmem:[%s1009_s5 + $0x38] sm:$0xff]   ;;  %v617_v5 = vld [vmem:[%s1008_s4] ss:$0 sm:$0xff]  ;;  %s761_s4 = scalar_lea.vmem %s582_s17, 32 }
  0x2d   :  { %681 = vmatprep.subr.bf16.mxu0 %v787_v38  ;;  %v626_v13 = vld [vmem:[%s1010_s6] ss:$0 sm:$0xff]  ;;  %p762_p0 = scmp.ne.s32.totalorder %s582_s17, %s761_s4  ;;  %p767_p2 = scmp.lt.s32.totalorder %s761_s4, %s761_s4 }
  0x2e   :  { %698 = vmatpush3.bf16.msra.mxu1 %v754_v48 }
  0x2f   :  { %699 = vmatprep.subr.bf16.mxu1 %v787_v38  ;;  %p768_p3 = por %p767_p2, %p766_p1 }
  0x30   :  { %682 = vmatpush3.bf16.msra.mxu0 %v748_v42 }
  0x31   :  { %683 = vmatprep.subr.bf16.mxu0 %v787_v38  ;;  %p769_p4 = pnand %p768_p3, %p762_p0 }
  0x32   :  { %700 = vmatpush3.bf16.msra.mxu1 %v755_v49 }
  0x33   :  { %701 = vmatprep.subr.bf16.mxu1 %v787_v38 }
  0x34   :  { %684 = vmatpush3.bf16.msra.mxu0 %v749_v43 }
  0x35   :  { %685 = vmatprep.subr.bf16.mxu0 %v787_v38 }
  0x36   :  { %702 = vmatpush3.bf16.msra.mxu1 %v756_v50 }
  0x37   :  { %703 = vmatprep.subr.bf16.mxu1 %v787_v38 }
  0x38   :  { %686 = vmatpush3.bf16.msra.mxu0 %v750_v44 }
  0x39   :  { %687 = vmatprep.subr.bf16.mxu0 %v787_v38 }
  0x3a   :  { %704 = vmatpush3.bf16.msra.mxu1 %v757_v51 }
  0x3b   :  { %705 = vmatprep.subr.bf16.mxu1 %v787_v38 }
  0x3c   :  { %688 = vmatpush3.bf16.msra.mxu0 %v751_v45 }
  0x3d   :  { %689 = vmatprep.subr.bf16.mxu0 %v787_v38 }
  0x3e   :  { %706 = vmatpush3.bf16.msra.mxu1 %v758_v52 }
  0x3f   :  { %707 = vmatprep.subr.bf16.mxu1 %v787_v38 }
  0x40   :  { %690 = vmatpush3.bf16.msra.mxu0 %v752_v46 }
  0x42   :  { %708 = vmatpush3.bf16.msra.mxu1 %v759_v3 }
  0x43   :  { %709 = vmatprep.subr.bf16.mxu1 %v787_v38 }
  0x46   :  { %710 = vmatpush3.bf16.msra.mxu1 %v760_v4 }
  0xf6   :  { %v651_v53 = vpop.f32.mrb[0].mxu0 }
  0xf7   :  { %v652_v54 = vpop.f32.mrb[1].mxu0 }
  0xf8   :  { %v653_v56 = vadd.f32 %v652_v54, %v651_v53  ;;  %v654_v57 = vpop.f32.mrb[2].mxu0 }
  0xf9   :  { %v655_v58 = vpop.f32.mrb[3].mxu0  ;;  %v342_v59 = vpop.f32.mrb[0].mxu1 }
  0xfa   :  { %v303_v60 = vadd.f32 %v653_v56, %v589_v55  ;;  %v344_v61 = vpop.f32.mrb[1].mxu1 }
  0xfb   :  { %v345_v62 = vpop.f32.mrb[2].mxu1 }
  0xfc   :  { %v343_v63 = vadd.f32 %v342_v59, %v303_v60  ;;  %v346_v0 = vpop.f32.mrb[3].mxu1 }
  0xfe   :  { %v348_v1 = vmax.f32 %v343_v63, 0.0 }
 0x100   :  { %v349_v2 = vpack.c.bf16 %v348_v1, %v348_v1 }
 0x102   :  { %692 = vmatmul.mubr.bf16.vlgmr.msra.gmra.mrb[4].mxu0 %v349_v2 }
 0x1d5   :  { %v455_v6 = vpop.f32.mrb[4].mxu0 }
 0x1d6   :  { %v456_v7 = vadd.f32 %v617_v5, %v455_v6  ;;  %v693_v8 = vpop.f32.mrb[5].mxu0 }
 0x1d7   :  { %v458_v9 = vpop.f32.mrb[6].mxu0 }
 0x1d8   :  { %v461_v10 = vmax.f32 %v456_v7, 0.0  ;;  %v694_v11 = vpop.f32.mrb[7].mxu0 }
 0x1da   :  { %v462_v12 = vpack.c.bf16 %v461_v10, %v461_v10 }
 0x1dc   :  { %712 = vmatmul.mubr.bf16.vlgmr.msra.gmra.mrb[4].mxu1 %v462_v12 }
 0x2af   :  { %v568_v14 = vpop.f32.mrb[4].mxu1 }
 0x2b0   :  { %v569_v15 = vadd.f32 %v626_v13, %v568_v14  ;;  %v713_v16 = vpop.f32.mrb[5].mxu1 }
 0x2b1   :  { %v571_v17 = vpop.f32.mrb[6].mxu1 }
 0x2b2   :  { %574 = vst [vmem:[#allocation2] sm:$0x3] %v569_v15  ;;  %v714_v18 = vpop.f32.mrb[7].mxu1 }
 0x2b3   :  { %772 = shalt.err (!%p769_p4)
}
 0x2b4   :  { %s773_s6 = scalar_lea.hbm %s1011_s7, 32 }
 0x2b5   :  { %p774_p5 = scmp.ne.s32.totalorder %s1011_s7, %s773_s6  ;;  %p777_p6 = scmp.lt.u32.totalorder %s773_s6, %s1011_s7 }
 0x2b7   :  { %p779_p7 = pnand %p777_p6, %p774_p5 }
 0x2b9   :  { %782 = shalt.err (!%p779_p7)
}
 0x2ba   :  { %584 = dma.vmem_to_hbm [thread:$0]  %s582_s17, 32, %s1011_s7, [#allocation3]  }
 0x2bb   :  { %783 = dma.done.wait [#allocation3], 32  }
 0x2bc   :  { %784 = vsyncadd [#allocation3], 4294967264 }
 0x2bd   :  { %588 = vsyncpa [#allocation3], 1 }

</bundles_post_ra>
